<compile_context>
chip_gen: v7x
topology: tpu7x:2x2x1
jax: 0.10.0
libtpu: 0.0.40
codegen_flags: <defaults>
</compile_context>

<pallas_src>
import functools
import math

import jax
import jax.numpy as jnp
from jax import lax
from jax.experimental import pallas as pl
from jax.experimental.pallas import tpu as pltpu

EPS = 1e-8


def _prelu(x, a):
    # PyTorch nn.PReLU() default: one shared slope parameter (init 0.25).
    return jnp.where(x >= 0, x, a * x)


def _gln(y, gamma, beta):
    # Global layer norm over (channel, time) of one batch element; y: [C, K] f32.
    # Two-pass mean/variance (matches the torch formulation) + folded affine;
    # rsqrt runs on the EUP slot.
    inv_n = 1.0 / float(y.shape[0] * y.shape[1])
    mean = jnp.sum(y) * inv_n
    dcen = y - mean
    var = jnp.sum(dcen * dcen) * inv_n
    scale = gamma * lax.rsqrt(var + EPS)          # [C, 1], per-channel affine folded in
    return dcen * scale + beta


def tcn_kernel(x_ref, w1_ref, g1_ref, b1_ref, dw_ref, g2_ref, b2_ref, w2_ref,
               a1_ref, a2_ref, o_ref, *, K, P, X, dilations, matmul_dtype):
    x = x_ref[0].astype(jnp.float32)                      # [B, K]  (channels, time)
    k_idx = lax.broadcasted_iota(jnp.int32, (1, K), 1)    # time index on the lane axis

    for xi in range(X):                                   # static unroll over blocks
        d = dilations[xi]
        pad = (P - 1) * d // 2                            # 'same' padding (P is odd)

        # --- conv1x1 (B -> H) on the MXU: y[h,k] = sum_b w1[h,b] x[b,k] ---
        y = jnp.dot(w1_ref[xi], x.astype(matmul_dtype),
                    preferred_element_type=jnp.float32)   # [H, K], f32 accumulate
        y = _prelu(y, a1_ref[xi])
        y = _gln(y, g1_ref[xi], b1_ref[xi])

        # --- depthwise conv (kernel P, dilation d, zero 'same' padding) ---
        dw_w = dw_ref[xi]                                 # [H, P], loaded once
        acc = jnp.zeros_like(y)
        for p in range(P):                                # static unroll over taps
            off = p * d - pad                             # time offset of this tap
            if off == 0:
                tap = y
            else:
                # shifted[:, k] = y[:, (k + off) mod K]; mask out the wrapped columns.
                shifted = pltpu.roll(y, shift=(-off) % K, axis=1)
                if off > 0:
                    valid = k_idx < (K - off)
                else:
                    valid = k_idx >= (-off)
                tap = jnp.where(valid, shifted, 0.0)
            acc = acc + dw_w[:, p:p + 1] * tap
        z = _prelu(acc, a2_ref[xi])
        z = _gln(z, g2_ref[xi], b2_ref[xi])

        # --- pointwise conv (H -> B) + residual; activation stays on-chip ---
        out = jnp.dot(w2_ref[xi], z.astype(matmul_dtype),
                      preferred_element_type=jnp.float32)  # [B, K]
        x = x + out

    o_ref[0] = x.astype(o_ref.dtype)


def tcn_forward(x_ncl, params, *, P, matmul_dtype=jnp.bfloat16,
                vmem_limit_bytes=48 * 1024 * 1024):
    """x_ncl: [M, B, K] (PyTorch NCL layout). Returns [M, B, K]."""
    M, B, K = x_ncl.shape
    X, H, _ = params["w1"].shape
    assert P % 2 == 1, "PyTorch 'same' padding (P-1)*d//2 only matches for odd P"
    # Dilation schedule matches the torch module exactly: dilation = 2**x, x in [0, X).
    dilations = tuple(2 ** i for i in range(X))

    # Only the MXU operands go to bf16; gLN/PReLU parameters and all elementwise
    # math stay f32.
    w1 = params["w1"].astype(matmul_dtype)   # [X, H, B]
    w2 = params["w2"].astype(matmul_dtype)   # [X, B, H]

    # Whole-array VMEM residents (fetched once, no double-buffering) for the
    # X-stacked weights/norm params; shared PReLU slopes in SMEM.
    vmem_spec = pl.BlockSpec(memory_space=pltpu.MemorySpace.VMEM)
    smem_spec = pl.BlockSpec(memory_space=pltpu.MemorySpace.SMEM)

    kernel = functools.partial(tcn_kernel, K=K, P=P, X=X,
                               dilations=dilations, matmul_dtype=matmul_dtype)
    return pl.pallas_call(
        kernel,
        out_shape=jax.ShapeDtypeStruct((M, B, K), x_ncl.dtype),
        grid=(M,),
        in_specs=[pl.BlockSpec((1, B, K), lambda m: (m, 0, 0)),   # activation block
                  vmem_spec,                                      # w1 [X, H, B]
                  vmem_spec, vmem_spec,                           # g1, b1 [X, H, 1]
                  vmem_spec,                                      # dw [X, H, P]
                  vmem_spec, vmem_spec,                           # g2, b2 [X, H, 1]
                  vmem_spec,                                      # w2 [X, B, H]
                  smem_spec, smem_spec],                          # a1, a2 [X]
        out_specs=pl.BlockSpec((1, B, K), lambda m: (m, 0, 0)),
        compiler_params=pltpu.CompilerParams(
            dimension_semantics=("parallel",),
            vmem_limit_bytes=vmem_limit_bytes),
    )(x_ncl, w1, params["g1"], params["b1"], params["dw"],
      params["g2"], params["b2"], w2, params["a1"], params["a2"])


def init_tcn_params(key, B, H, P, X):
    """Stacked parameters for X TemporalBlocks, matching the torch module shapes.

    conv1x1   weight [H, B, 1] -> w1[x] = [H, B]
    depthwise weight [H, 1, P] -> dw[x] = [H, P]
    pointwise weight [B, H, 1] -> w2[x] = [B, H]
    PReLU: single shared slope = 0.25 (PyTorch default); gLN gamma=1, beta=0 (per-channel).
    """
    k1, k2, k3 = jax.random.split(key, 3)
    kb1 = 1.0 / math.sqrt(B)   # conv1x1   fan_in = B * 1
    kdw = 1.0 / math.sqrt(P)   # depthwise fan_in = 1 * P (groups=H)
    kb2 = 1.0 / math.sqrt(H)   # pointwise fan_in = H * 1
    return dict(
        w1=jax.random.uniform(k1, (X, H, B), jnp.float32, -kb1, kb1),
        g1=jnp.ones((X, H, 1), jnp.float32),
        b1=jnp.zeros((X, H, 1), jnp.float32),
        dw=jax.random.uniform(k2, (X, H, P), jnp.float32, -kdw, kdw),
        g2=jnp.ones((X, H, 1), jnp.float32),
        b2=jnp.zeros((X, H, 1), jnp.float32),
        w2=jax.random.uniform(k3, (X, B, H), jnp.float32, -kb2, kb2),
        a1=jnp.full((X,), 0.25, jnp.float32),
        a2=jnp.full((X,), 0.25, jnp.float32),
    )


# ----------------------- pure-JAX reference (for checking) -----------------------
def _gln_ref(y, gamma, beta):
    # Two-pass gLN exactly as the PyTorch module writes it; y: [M, C, K].
    mean = jnp.mean(y, axis=(1, 2), keepdims=True)
    var = jnp.mean((y - mean) ** 2, axis=(1, 2), keepdims=True)
    return gamma * (y - mean) / jnp.sqrt(var + EPS) + beta


def tcn_reference(x_ncl, params, *, P):
    x = x_ncl.astype(jnp.float32)                 # [M, B, K]
    K = x.shape[2]
    X = params["w1"].shape[0]
    for xi in range(X):
        d = 2 ** xi
        pad = (P - 1) * d // 2
        a1 = params["a1"][xi]
        a2 = params["a2"][xi]
        y = jnp.einsum("hb,mbk->mhk", params["w1"][xi], x)
        y = jnp.where(y >= 0, y, a1 * y)
        y = _gln_ref(y, params["g1"][xi], params["b1"][xi])
        yp = jnp.pad(y, ((0, 0), (0, 0), (pad, pad)))
        z = jnp.zeros_like(y)
        for p in range(P):
            z = z + params["dw"][xi][:, p:p + 1] * yp[:, :, p * d:p * d + K]
        z = jnp.where(z >= 0, z, a2 * z)
        z = _gln_ref(z, params["g2"][xi], params["b2"][xi])
        x = x + jnp.einsum("bh,mhk->mbk", params["w2"][xi], z)
    return x


if __name__ == "__main__":
    # Small shapes consistent with tcn(B, H, P, X): bottleneck B=16, hidden H=32,
    # kernel P=3, X=4 blocks; NCL input [M, B, K] with M=2 and lane-dense K=128.
    M, B, H, P, X, K = 2, 16, 32, 3, 4, 128

    key = jax.random.PRNGKey(0)
    key, kx = jax.random.split(key)
    x = jax.random.normal(kx, (M, B, K), dtype=jnp.float32)
    params = init_tcn_params(key, B, H, P, X)

    ref = jax.block_until_ready(tcn_reference(x, params, P=P))

    # f32 MXU operands: sanity check against the PyTorch-style reference.
    out_f32 = jax.block_until_ready(
        tcn_forward(x, params, P=P, matmul_dtype=jnp.float32))
    assert out_f32.shape == (M, B, K) and out_f32.dtype == jnp.float32
    err_f32 = float(jnp.max(jnp.abs(out_f32 - ref)))
    assert jnp.allclose(out_f32, ref, atol=3e-2, rtol=3e-2), err_f32

    # bf16 MXU operands (production config): looser tolerance.
    out_bf16 = jax.block_until_ready(
        tcn_forward(x, params, P=P, matmul_dtype=jnp.bfloat16))
    assert out_bf16.shape == (M, B, K) and out_bf16.dtype == jnp.float32
    err_bf16 = float(jnp.max(jnp.abs(out_bf16 - ref)))
    assert jnp.allclose(out_bf16, ref, atol=1e-1, rtol=1e-1), err_bf16

    print("KERNEL_OK")
</pallas_src>

<mosaic_0001>
module attributes {stable_mosaic.version = 11 : i64} {
  func.func @tcn_kernel(%arg0: i32, %arg1: memref<1x16x128xf32, #tpu.memory_space<vmem>>, %arg2: memref<4x32x16xf32, #tpu.memory_space<vmem>>, %arg3: memref<4x32x1xf32, #tpu.memory_space<vmem>>, %arg4: memref<4x32x1xf32, #tpu.memory_space<vmem>>, %arg5: memref<4x32x3xf32, #tpu.memory_space<vmem>>, %arg6: memref<4x32x1xf32, #tpu.memory_space<vmem>>, %arg7: memref<4x32x1xf32, #tpu.memory_space<vmem>>, %arg8: memref<4x16x32xf32, #tpu.memory_space<vmem>>, %arg9: memref<4xf32, #tpu.memory_space<smem>>, %arg10: memref<4xf32, #tpu.memory_space<smem>>, %arg11: memref<1x16x128xf32, #tpu.memory_space<vmem>>) attributes {dimension_semantics = [#tpu.dimension_semantics<parallel>], iteration_bounds = array<i64: 2>, scalar_prefetch = 0 : i64, scratch_operands = 0 : i64, tpu.core_type = #tpu.core_type<tc>, window_params = [{transform_indices = @transform_0, window_bounds = array<i64: 1, 16, 128>}, {pipeline_mode = #tpu.pipeline_mode<synchronous>, transform_indices = @transform_1, window_bounds = array<i64: 4, 32, 16>}, {pipeline_mode = #tpu.pipeline_mode<synchronous>, transform_indices = @transform_2, window_bounds = array<i64: 4, 32, 1>}, {pipeline_mode = #tpu.pipeline_mode<synchronous>, transform_indices = @transform_3, window_bounds = array<i64: 4, 32, 1>}, {pipeline_mode = #tpu.pipeline_mode<synchronous>, transform_indices = @transform_4, window_bounds = array<i64: 4, 32, 3>}, {pipeline_mode = #tpu.pipeline_mode<synchronous>, transform_indices = @transform_5, window_bounds = array<i64: 4, 32, 1>}, {pipeline_mode = #tpu.pipeline_mode<synchronous>, transform_indices = @transform_6, window_bounds = array<i64: 4, 32, 1>}, {pipeline_mode = #tpu.pipeline_mode<synchronous>, transform_indices = @transform_7, window_bounds = array<i64: 4, 16, 32>}, {transform_indices = @transform_8, window_bounds = array<i64: 4>}, {transform_indices = @transform_9, window_bounds = array<i64: 4>}, {transform_indices = @transform_10, window_bounds = array<i64: 1, 16, 128>}]} {
    %c0 = arith.constant 0 : index
    %c0_0 = arith.constant 0 : index
    %c0_1 = arith.constant 0 : index
    %0 = vector.load %arg1[%c0, %c0_0, %c0_1] : memref<1x16x128xf32, #tpu.memory_space<vmem>>, vector<1x16x128xf32>
    %1 = vector.shape_cast %0 : vector<1x16x128xf32> to vector<16x128xf32>
    %2 = tpu.iota {dimensions = array<i32: 1>} : vector<1x128xi32>
    %c0_2 = arith.constant 0 : index
    %c0_3 = arith.constant 0 : index
    %c0_4 = arith.constant 0 : index
    %3 = vector.load %arg2[%c0_2, %c0_3, %c0_4] : memref<4x32x16xf32, #tpu.memory_space<vmem>>, vector<1x32x16xf32>
    %4 = vector.shape_cast %3 : vector<1x32x16xf32> to vector<32x16xf32>
    %cst = arith.constant dense<0.000000e+00> : vector<32x128xf32>
    %5 = tpu.matmul %4, %1, %cst {dimension_numbers = #tpu.dot_dimension_numbers<[1], [0], [0], [1], [0, 0, 1, 1], [], []>} : vector<32x16xf32>, vector<16x128xf32>, vector<32x128xf32> -> vector<32x128xf32>
    %c0_5 = arith.constant 0 : index
    %6 = memref.load %arg9[%c0_5] : memref<4xf32, #tpu.memory_space<smem>>
    %cst_6 = arith.constant 0.000000e+00 : f32
    %7 = vector.broadcast %cst_6 : f32 to vector<32x128xf32>
    %8 = arith.cmpf oge, %5, %7 : vector<32x128xf32>
    %9 = vector.broadcast %6 : f32 to vector<32x128xf32>
    %10 = arith.mulf %9, %5 : vector<32x128xf32>
    %11 = arith.select %8, %5, %10 : vector<32x128xi1>, vector<32x128xf32>
    %c0_7 = arith.constant 0 : index
    %c0_8 = arith.constant 0 : index
    %c0_9 = arith.constant 0 : index
    %12 = vector.load %arg3[%c0_7, %c0_8, %c0_9] : memref<4x32x1xf32, #tpu.memory_space<vmem>>, vector<1x32x1xf32>
    %13 = vector.shape_cast %12 : vector<1x32x1xf32> to vector<32x1xf32>
    %c0_10 = arith.constant 0 : index
    %c0_11 = arith.constant 0 : index
    %c0_12 = arith.constant 0 : index
    %14 = vector.load %arg4[%c0_10, %c0_11, %c0_12] : memref<4x32x1xf32, #tpu.memory_space<vmem>>, vector<1x32x1xf32>
    %15 = vector.shape_cast %14 : vector<1x32x1xf32> to vector<32x1xf32>
    %16 = vector.shape_cast %11 : vector<32x128xf32> to vector<1x32x128xf32>
    %cst_13 = arith.constant dense<0.000000e+00> : vector<1xf32>
    %17 = vector.multi_reduction <add>, %16, %cst_13 [1, 2] : vector<1x32x128xf32> to vector<1xf32>
    %18 = vector.shape_cast %17 : vector<1xf32> to vector<1x1x1xf32>
    %19 = vector.extract %18[0, 0, 0] : f32 from vector<1x1x1xf32>
    %cst_14 = arith.constant 2.44140625E-4 : f32
    %20 = arith.mulf %19, %cst_14 : f32
    %21 = vector.broadcast %20 : f32 to vector<32x128xf32>
    %22 = arith.subf %11, %21 : vector<32x128xf32>
    %23 = arith.mulf %22, %22 : vector<32x128xf32>
    %24 = vector.shape_cast %23 : vector<32x128xf32> to vector<1x32x128xf32>
    %cst_15 = arith.constant dense<0.000000e+00> : vector<1xf32>
    %25 = vector.multi_reduction <add>, %24, %cst_15 [1, 2] : vector<1x32x128xf32> to vector<1xf32>
    %26 = vector.shape_cast %25 : vector<1xf32> to vector<1x1x1xf32>
    %27 = vector.extract %26[0, 0, 0] : f32 from vector<1x1x1xf32>
    %cst_16 = arith.constant 2.44140625E-4 : f32
    %28 = arith.mulf %27, %cst_16 : f32
    %cst_17 = arith.constant 9.99999993E-9 : f32
    %29 = arith.addf %28, %cst_17 : f32
    %30 = math.rsqrt %29 : f32
    %31 = vector.broadcast %30 : f32 to vector<32x1xf32>
    %32 = arith.mulf %13, %31 : vector<32x1xf32>
    %33 = vector.broadcast %32 : vector<32x1xf32> to vector<32x128xf32>
    %34 = arith.mulf %22, %33 : vector<32x128xf32>
    %35 = vector.broadcast %15 : vector<32x1xf32> to vector<32x128xf32>
    %36 = arith.addf %34, %35 : vector<32x128xf32>
    %c0_18 = arith.constant 0 : index
    %c0_19 = arith.constant 0 : index
    %c0_20 = arith.constant 0 : index
    %37 = vector.load %arg5[%c0_18, %c0_19, %c0_20] : memref<4x32x3xf32, #tpu.memory_space<vmem>>, vector<1x32x3xf32>
    %38 = vector.shape_cast %37 : vector<1x32x3xf32> to vector<32x3xf32>
    %cst_21 = arith.constant 0.000000e+00 : f32
    %39 = vector.broadcast %cst_21 : f32 to vector<32x128xf32>
    %c1_i32 = arith.constant 1 : i32
    %40 = tpu.dynamic_rotate %36 by %c1_i32 dim 1 : vector<32x128xf32>, i32 -> vector<32x128xf32>
    %c1_i32_22 = arith.constant 1 : i32
    %41 = vector.broadcast %c1_i32_22 : i32 to vector<1x128xi32>
    %42 = arith.cmpi sge, %2, %41 : vector<1x128xi32>
    %cst_23 = arith.constant 0.000000e+00 : f32
    %43 = vector.shape_cast %42 : vector<1x128xi1> to vector<1x128xi1>
    %44 = vector.broadcast %43 : vector<1x128xi1> to vector<32x128xi1>
    %45 = vector.broadcast %cst_23 : f32 to vector<32x128xf32>
    %46 = arith.select %44, %40, %45 : vector<32x128xi1>, vector<32x128xf32>
    %47 = vector.extract_strided_slice %38 {offsets = [0, 0], sizes = [32, 1], strides = [1, 1]} : vector<32x3xf32> to vector<32x1xf32>
    %48 = vector.broadcast %47 : vector<32x1xf32> to vector<32x128xf32>
    %49 = arith.mulf %48, %46 : vector<32x128xf32>
    %50 = arith.addf %39, %49 : vector<32x128xf32>
    %51 = vector.extract_strided_slice %38 {offsets = [0, 1], sizes = [32, 1], strides = [1, 1]} : vector<32x3xf32> to vector<32x1xf32>
    %52 = vector.broadcast %51 : vector<32x1xf32> to vector<32x128xf32>
    %53 = arith.mulf %52, %36 : vector<32x128xf32>
    %54 = arith.addf %50, %53 : vector<32x128xf32>
    %c127_i32 = arith.constant 127 : i32
    %55 = tpu.dynamic_rotate %36 by %c127_i32 dim 1 : vector<32x128xf32>, i32 -> vector<32x128xf32>
    %c127_i32_24 = arith.constant 127 : i32
    %56 = vector.broadcast %c127_i32_24 : i32 to vector<1x128xi32>
    %57 = arith.cmpi slt, %2, %56 : vector<1x128xi32>
    %cst_25 = arith.constant 0.000000e+00 : f32
    %58 = vector.shape_cast %57 : vector<1x128xi1> to vector<1x128xi1>
    %59 = vector.broadcast %58 : vector<1x128xi1> to vector<32x128xi1>
    %60 = vector.broadcast %cst_25 : f32 to vector<32x128xf32>
    %61 = arith.select %59, %55, %60 : vector<32x128xi1>, vector<32x128xf32>
    %62 = vector.extract_strided_slice %38 {offsets = [0, 2], sizes = [32, 1], strides = [1, 1]} : vector<32x3xf32> to vector<32x1xf32>
    %63 = vector.broadcast %62 : vector<32x1xf32> to vector<32x128xf32>
    %64 = arith.mulf %63, %61 : vector<32x128xf32>
    %65 = arith.addf %54, %64 : vector<32x128xf32>
    %c0_26 = arith.constant 0 : index
    %66 = memref.load %arg10[%c0_26] : memref<4xf32, #tpu.memory_space<smem>>
    %cst_27 = arith.constant 0.000000e+00 : f32
    %67 = vector.broadcast %cst_27 : f32 to vector<32x128xf32>
    %68 = arith.cmpf oge, %65, %67 : vector<32x128xf32>
    %69 = vector.broadcast %66 : f32 to vector<32x128xf32>
    %70 = arith.mulf %69, %65 : vector<32x128xf32>
    %71 = arith.select %68, %65, %70 : vector<32x128xi1>, vector<32x128xf32>
    %c0_28 = arith.constant 0 : index
    %c0_29 = arith.constant 0 : index
    %c0_30 = arith.constant 0 : index
    %72 = vector.load %arg6[%c0_28, %c0_29, %c0_30] : memref<4x32x1xf32, #tpu.memory_space<vmem>>, vector<1x32x1xf32>
    %73 = vector.shape_cast %72 : vector<1x32x1xf32> to vector<32x1xf32>
    %c0_31 = arith.constant 0 : index
    %c0_32 = arith.constant 0 : index
    %c0_33 = arith.constant 0 : index
    %74 = vector.load %arg7[%c0_31, %c0_32, %c0_33] : memref<4x32x1xf32, #tpu.memory_space<vmem>>, vector<1x32x1xf32>
    %75 = vector.shape_cast %74 : vector<1x32x1xf32> to vector<32x1xf32>
    %76 = vector.shape_cast %71 : vector<32x128xf32> to vector<1x32x128xf32>
    %cst_34 = arith.constant dense<0.000000e+00> : vector<1xf32>
    %77 = vector.multi_reduction <add>, %76, %cst_34 [1, 2] : vector<1x32x128xf32> to vector<1xf32>
    %78 = vector.shape_cast %77 : vector<1xf32> to vector<1x1x1xf32>
    %79 = vector.extract %78[0, 0, 0] : f32 from vector<1x1x1xf32>
    %cst_35 = arith.constant 2.44140625E-4 : f32
    %80 = arith.mulf %79, %cst_35 : f32
    %81 = vector.broadcast %80 : f32 to vector<32x128xf32>
    %82 = arith.subf %71, %81 : vector<32x128xf32>
    %83 = arith.mulf %82, %82 : vector<32x128xf32>
    %84 = vector.shape_cast %83 : vector<32x128xf32> to vector<1x32x128xf32>
    %cst_36 = arith.constant dense<0.000000e+00> : vector<1xf32>
    %85 = vector.multi_reduction <add>, %84, %cst_36 [1, 2] : vector<1x32x128xf32> to vector<1xf32>
    %86 = vector.shape_cast %85 : vector<1xf32> to vector<1x1x1xf32>
    %87 = vector.extract %86[0, 0, 0] : f32 from vector<1x1x1xf32>
    %cst_37 = arith.constant 2.44140625E-4 : f32
    %88 = arith.mulf %87, %cst_37 : f32
    %cst_38 = arith.constant 9.99999993E-9 : f32
    %89 = arith.addf %88, %cst_38 : f32
    %90 = math.rsqrt %89 : f32
    %91 = vector.broadcast %90 : f32 to vector<32x1xf32>
    %92 = arith.mulf %73, %91 : vector<32x1xf32>
    %93 = vector.broadcast %92 : vector<32x1xf32> to vector<32x128xf32>
    %94 = arith.mulf %82, %93 : vector<32x128xf32>
    %95 = vector.broadcast %75 : vector<32x1xf32> to vector<32x128xf32>
    %96 = arith.addf %94, %95 : vector<32x128xf32>
    %c0_39 = arith.constant 0 : index
    %c0_40 = arith.constant 0 : index
    %c0_41 = arith.constant 0 : index
    %97 = vector.load %arg8[%c0_39, %c0_40, %c0_41] : memref<4x16x32xf32, #tpu.memory_space<vmem>>, vector<1x16x32xf32>
    %98 = vector.shape_cast %97 : vector<1x16x32xf32> to vector<16x32xf32>
    %cst_42 = arith.constant dense<0.000000e+00> : vector<16x128xf32>
    %99 = tpu.matmul %98, %96, %cst_42 {dimension_numbers = #tpu.dot_dimension_numbers<[1], [0], [0], [1], [0, 0, 1, 1], [], []>} : vector<16x32xf32>, vector<32x128xf32>, vector<16x128xf32> -> vector<16x128xf32>
    %100 = arith.addf %1, %99 : vector<16x128xf32>
    %c1 = arith.constant 1 : index
    %c0_43 = arith.constant 0 : index
    %c0_44 = arith.constant 0 : index
    %101 = vector.load %arg2[%c1, %c0_43, %c0_44] : memref<4x32x16xf32, #tpu.memory_space<vmem>>, vector<1x32x16xf32>
    %102 = vector.shape_cast %101 : vector<1x32x16xf32> to vector<32x16xf32>
    %cst_45 = arith.constant dense<0.000000e+00> : vector<32x128xf32>
    %103 = tpu.matmul %102, %100, %cst_45 {dimension_numbers = #tpu.dot_dimension_numbers<[1], [0], [0], [1], [0, 0, 1, 1], [], []>} : vector<32x16xf32>, vector<16x128xf32>, vector<32x128xf32> -> vector<32x128xf32>
    %c1_46 = arith.constant 1 : index
    %104 = memref.load %arg9[%c1_46] : memref<4xf32, #tpu.memory_space<smem>>
    %cst_47 = arith.constant 0.000000e+00 : f32
    %105 = vector.broadcast %cst_47 : f32 to vector<32x128xf32>
    %106 = arith.cmpf oge, %103, %105 : vector<32x128xf32>
    %107 = vector.broadcast %104 : f32 to vector<32x128xf32>
    %108 = arith.mulf %107, %103 : vector<32x128xf32>
    %109 = arith.select %106, %103, %108 : vector<32x128xi1>, vector<32x128xf32>
    %c1_48 = arith.constant 1 : index
    %c0_49 = arith.constant 0 : index
    %c0_50 = arith.constant 0 : index
    %110 = vector.load %arg3[%c1_48, %c0_49, %c0_50] : memref<4x32x1xf32, #tpu.memory_space<vmem>>, vector<1x32x1xf32>
    %111 = vector.shape_cast %110 : vector<1x32x1xf32> to vector<32x1xf32>
    %c1_51 = arith.constant 1 : index
    %c0_52 = arith.constant 0 : index
    %c0_53 = arith.constant 0 : index
    %112 = vector.load %arg4[%c1_51, %c0_52, %c0_53] : memref<4x32x1xf32, #tpu.memory_space<vmem>>, vector<1x32x1xf32>
    %113 = vector.shape_cast %112 : vector<1x32x1xf32> to vector<32x1xf32>
    %114 = vector.shape_cast %109 : vector<32x128xf32> to vector<1x32x128xf32>
    %cst_54 = arith.constant dense<0.000000e+00> : vector<1xf32>
    %115 = vector.multi_reduction <add>, %114, %cst_54 [1, 2] : vector<1x32x128xf32> to vector<1xf32>
    %116 = vector.shape_cast %115 : vector<1xf32> to vector<1x1x1xf32>
    %117 = vector.extract %116[0, 0, 0] : f32 from vector<1x1x1xf32>
    %cst_55 = arith.constant 2.44140625E-4 : f32
    %118 = arith.mulf %117, %cst_55 : f32
    %119 = vector.broadcast %118 : f32 to vector<32x128xf32>
    %120 = arith.subf %109, %119 : vector<32x128xf32>
    %121 = arith.mulf %120, %120 : vector<32x128xf32>
    %122 = vector.shape_cast %121 : vector<32x128xf32> to vector<1x32x128xf32>
    %cst_56 = arith.constant dense<0.000000e+00> : vector<1xf32>
    %123 = vector.multi_reduction <add>, %122, %cst_56 [1, 2] : vector<1x32x128xf32> to vector<1xf32>
    %124 = vector.shape_cast %123 : vector<1xf32> to vector<1x1x1xf32>
    %125 = vector.extract %124[0, 0, 0] : f32 from vector<1x1x1xf32>
    %cst_57 = arith.constant 2.44140625E-4 : f32
    %126 = arith.mulf %125, %cst_57 : f32
    %cst_58 = arith.constant 9.99999993E-9 : f32
    %127 = arith.addf %126, %cst_58 : f32
    %128 = math.rsqrt %127 : f32
    %129 = vector.broadcast %128 : f32 to vector<32x1xf32>
    %130 = arith.mulf %111, %129 : vector<32x1xf32>
    %131 = vector.broadcast %130 : vector<32x1xf32> to vector<32x128xf32>
    %132 = arith.mulf %120, %131 : vector<32x128xf32>
    %133 = vector.broadcast %113 : vector<32x1xf32> to vector<32x128xf32>
    %134 = arith.addf %132, %133 : vector<32x128xf32>
    %c1_59 = arith.constant 1 : index
    %c0_60 = arith.constant 0 : index
    %c0_61 = arith.constant 0 : index
    %135 = vector.load %arg5[%c1_59, %c0_60, %c0_61] : memref<4x32x3xf32, #tpu.memory_space<vmem>>, vector<1x32x3xf32>
    %136 = vector.shape_cast %135 : vector<1x32x3xf32> to vector<32x3xf32>
    %cst_62 = arith.constant 0.000000e+00 : f32
    %137 = vector.broadcast %cst_62 : f32 to vector<32x128xf32>
    %c2_i32 = arith.constant 2 : i32
    %138 = tpu.dynamic_rotate %134 by %c2_i32 dim 1 : vector<32x128xf32>, i32 -> vector<32x128xf32>
    %c2_i32_63 = arith.constant 2 : i32
    %139 = vector.broadcast %c2_i32_63 : i32 to vector<1x128xi32>
    %140 = arith.cmpi sge, %2, %139 : vector<1x128xi32>
    %cst_64 = arith.constant 0.000000e+00 : f32
    %141 = vector.shape_cast %140 : vector<1x128xi1> to vector<1x128xi1>
    %142 = vector.broadcast %141 : vector<1x128xi1> to vector<32x128xi1>
    %143 = vector.broadcast %cst_64 : f32 to vector<32x128xf32>
    %144 = arith.select %142, %138, %143 : vector<32x128xi1>, vector<32x128xf32>
    %145 = vector.extract_strided_slice %136 {offsets = [0, 0], sizes = [32, 1], strides = [1, 1]} : vector<32x3xf32> to vector<32x1xf32>
    %146 = vector.broadcast %145 : vector<32x1xf32> to vector<32x128xf32>
    %147 = arith.mulf %146, %144 : vector<32x128xf32>
    %148 = arith.addf %137, %147 : vector<32x128xf32>
    %149 = vector.extract_strided_slice %136 {offsets = [0, 1], sizes = [32, 1], strides = [1, 1]} : vector<32x3xf32> to vector<32x1xf32>
    %150 = vector.broadcast %149 : vector<32x1xf32> to vector<32x128xf32>
    %151 = arith.mulf %150, %134 : vector<32x128xf32>
    %152 = arith.addf %148, %151 : vector<32x128xf32>
    %c126_i32 = arith.constant 126 : i32
    %153 = tpu.dynamic_rotate %134 by %c126_i32 dim 1 : vector<32x128xf32>, i32 -> vector<32x128xf32>
    %c126_i32_65 = arith.constant 126 : i32
    %154 = vector.broadcast %c126_i32_65 : i32 to vector<1x128xi32>
    %155 = arith.cmpi slt, %2, %154 : vector<1x128xi32>
    %cst_66 = arith.constant 0.000000e+00 : f32
    %156 = vector.shape_cast %155 : vector<1x128xi1> to vector<1x128xi1>
    %157 = vector.broadcast %156 : vector<1x128xi1> to vector<32x128xi1>
    %158 = vector.broadcast %cst_66 : f32 to vector<32x128xf32>
    %159 = arith.select %157, %153, %158 : vector<32x128xi1>, vector<32x128xf32>
    %160 = vector.extract_strided_slice %136 {offsets = [0, 2], sizes = [32, 1], strides = [1, 1]} : vector<32x3xf32> to vector<32x1xf32>
    %161 = vector.broadcast %160 : vector<32x1xf32> to vector<32x128xf32>
    %162 = arith.mulf %161, %159 : vector<32x128xf32>
    %163 = arith.addf %152, %162 : vector<32x128xf32>
    %c1_67 = arith.constant 1 : index
    %164 = memref.load %arg10[%c1_67] : memref<4xf32, #tpu.memory_space<smem>>
    %cst_68 = arith.constant 0.000000e+00 : f32
    %165 = vector.broadcast %cst_68 : f32 to vector<32x128xf32>
    %166 = arith.cmpf oge, %163, %165 : vector<32x128xf32>
    %167 = vector.broadcast %164 : f32 to vector<32x128xf32>
    %168 = arith.mulf %167, %163 : vector<32x128xf32>
    %169 = arith.select %166, %163, %168 : vector<32x128xi1>, vector<32x128xf32>
    %c1_69 = arith.constant 1 : index
    %c0_70 = arith.constant 0 : index
    %c0_71 = arith.constant 0 : index
    %170 = vector.load %arg6[%c1_69, %c0_70, %c0_71] : memref<4x32x1xf32, #tpu.memory_space<vmem>>, vector<1x32x1xf32>
    %171 = vector.shape_cast %170 : vector<1x32x1xf32> to vector<32x1xf32>
    %c1_72 = arith.constant 1 : index
    %c0_73 = arith.constant 0 : index
    %c0_74 = arith.constant 0 : index
    %172 = vector.load %arg7[%c1_72, %c0_73, %c0_74] : memref<4x32x1xf32, #tpu.memory_space<vmem>>, vector<1x32x1xf32>
    %173 = vector.shape_cast %172 : vector<1x32x1xf32> to vector<32x1xf32>
    %174 = vector.shape_cast %169 : vector<32x128xf32> to vector<1x32x128xf32>
    %cst_75 = arith.constant dense<0.000000e+00> : vector<1xf32>
    %175 = vector.multi_reduction <add>, %174, %cst_75 [1, 2] : vector<1x32x128xf32> to vector<1xf32>
    %176 = vector.shape_cast %175 : vector<1xf32> to vector<1x1x1xf32>
    %177 = vector.extract %176[0, 0, 0] : f32 from vector<1x1x1xf32>
    %cst_76 = arith.constant 2.44140625E-4 : f32
    %178 = arith.mulf %177, %cst_76 : f32
    %179 = vector.broadcast %178 : f32 to vector<32x128xf32>
    %180 = arith.subf %169, %179 : vector<32x128xf32>
    %181 = arith.mulf %180, %180 : vector<32x128xf32>
    %182 = vector.shape_cast %181 : vector<32x128xf32> to vector<1x32x128xf32>
    %cst_77 = arith.constant dense<0.000000e+00> : vector<1xf32>
    %183 = vector.multi_reduction <add>, %182, %cst_77 [1, 2] : vector<1x32x128xf32> to vector<1xf32>
    %184 = vector.shape_cast %183 : vector<1xf32> to vector<1x1x1xf32>
    %185 = vector.extract %184[0, 0, 0] : f32 from vector<1x1x1xf32>
    %cst_78 = arith.constant 2.44140625E-4 : f32
    %186 = arith.mulf %185, %cst_78 : f32
    %cst_79 = arith.constant 9.99999993E-9 : f32
    %187 = arith.addf %186, %cst_79 : f32
    %188 = math.rsqrt %187 : f32
    %189 = vector.broadcast %188 : f32 to vector<32x1xf32>
    %190 = arith.mulf %171, %189 : vector<32x1xf32>
    %191 = vector.broadcast %190 : vector<32x1xf32> to vector<32x128xf32>
    %192 = arith.mulf %180, %191 : vector<32x128xf32>
    %193 = vector.broadcast %173 : vector<32x1xf32> to vector<32x128xf32>
    %194 = arith.addf %192, %193 : vector<32x128xf32>
    %c1_80 = arith.constant 1 : index
    %c0_81 = arith.constant 0 : index
    %c0_82 = arith.constant 0 : index
    %195 = vector.load %arg8[%c1_80, %c0_81, %c0_82] : memref<4x16x32xf32, #tpu.memory_space<vmem>>, vector<1x16x32xf32>
    %196 = vector.shape_cast %195 : vector<1x16x32xf32> to vector<16x32xf32>
    %cst_83 = arith.constant dense<0.000000e+00> : vector<16x128xf32>
    %197 = tpu.matmul %196, %194, %cst_83 {dimension_numbers = #tpu.dot_dimension_numbers<[1], [0], [0], [1], [0, 0, 1, 1], [], []>} : vector<16x32xf32>, vector<32x128xf32>, vector<16x128xf32> -> vector<16x128xf32>
    %198 = arith.addf %100, %197 : vector<16x128xf32>
    %c2 = arith.constant 2 : index
    %c0_84 = arith.constant 0 : index
    %c0_85 = arith.constant 0 : index
    %199 = vector.load %arg2[%c2, %c0_84, %c0_85] : memref<4x32x16xf32, #tpu.memory_space<vmem>>, vector<1x32x16xf32>
    %200 = vector.shape_cast %199 : vector<1x32x16xf32> to vector<32x16xf32>
    %cst_86 = arith.constant dense<0.000000e+00> : vector<32x128xf32>
    %201 = tpu.matmul %200, %198, %cst_86 {dimension_numbers = #tpu.dot_dimension_numbers<[1], [0], [0], [1], [0, 0, 1, 1], [], []>} : vector<32x16xf32>, vector<16x128xf32>, vector<32x128xf32> -> vector<32x128xf32>
    %c2_87 = arith.constant 2 : index
    %202 = memref.load %arg9[%c2_87] : memref<4xf32, #tpu.memory_space<smem>>
    %cst_88 = arith.constant 0.000000e+00 : f32
    %203 = vector.broadcast %cst_88 : f32 to vector<32x128xf32>
    %204 = arith.cmpf oge, %201, %203 : vector<32x128xf32>
    %205 = vector.broadcast %202 : f32 to vector<32x128xf32>
    %206 = arith.mulf %205, %201 : vector<32x128xf32>
    %207 = arith.select %204, %201, %206 : vector<32x128xi1>, vector<32x128xf32>
    %c2_89 = arith.constant 2 : index
    %c0_90 = arith.constant 0 : index
    %c0_91 = arith.constant 0 : index
    %208 = vector.load %arg3[%c2_89, %c0_90, %c0_91] : memref<4x32x1xf32, #tpu.memory_space<vmem>>, vector<1x32x1xf32>
    %209 = vector.shape_cast %208 : vector<1x32x1xf32> to vector<32x1xf32>
    %c2_92 = arith.constant 2 : index
    %c0_93 = arith.constant 0 : index
    %c0_94 = arith.constant 0 : index
    %210 = vector.load %arg4[%c2_92, %c0_93, %c0_94] : memref<4x32x1xf32, #tpu.memory_space<vmem>>, vector<1x32x1xf32>
    %211 = vector.shape_cast %210 : vector<1x32x1xf32> to vector<32x1xf32>
    %212 = vector.shape_cast %207 : vector<32x128xf32> to vector<1x32x128xf32>
    %cst_95 = arith.constant dense<0.000000e+00> : vector<1xf32>
    %213 = vector.multi_reduction <add>, %212, %cst_95 [1, 2] : vector<1x32x128xf32> to vector<1xf32>
    %214 = vector.shape_cast %213 : vector<1xf32> to vector<1x1x1xf32>
    %215 = vector.extract %214[0, 0, 0] : f32 from vector<1x1x1xf32>
    %cst_96 = arith.constant 2.44140625E-4 : f32
    %216 = arith.mulf %215, %cst_96 : f32
    %217 = vector.broadcast %216 : f32 to vector<32x128xf32>
    %218 = arith.subf %207, %217 : vector<32x128xf32>
    %219 = arith.mulf %218, %218 : vector<32x128xf32>
    %220 = vector.shape_cast %219 : vector<32x128xf32> to vector<1x32x128xf32>
    %cst_97 = arith.constant dense<0.000000e+00> : vector<1xf32>
    %221 = vector.multi_reduction <add>, %220, %cst_97 [1, 2] : vector<1x32x128xf32> to vector<1xf32>
    %222 = vector.shape_cast %221 : vector<1xf32> to vector<1x1x1xf32>
    %223 = vector.extract %222[0, 0, 0] : f32 from vector<1x1x1xf32>
    %cst_98 = arith.constant 2.44140625E-4 : f32
    %224 = arith.mulf %223, %cst_98 : f32
    %cst_99 = arith.constant 9.99999993E-9 : f32
    %225 = arith.addf %224, %cst_99 : f32
    %226 = math.rsqrt %225 : f32
    %227 = vector.broadcast %226 : f32 to vector<32x1xf32>
    %228 = arith.mulf %209, %227 : vector<32x1xf32>
    %229 = vector.broadcast %228 : vector<32x1xf32> to vector<32x128xf32>
    %230 = arith.mulf %218, %229 : vector<32x128xf32>
    %231 = vector.broadcast %211 : vector<32x1xf32> to vector<32x128xf32>
    %232 = arith.addf %230, %231 : vector<32x128xf32>
    %c2_100 = arith.constant 2 : index
    %c0_101 = arith.constant 0 : index
    %c0_102 = arith.constant 0 : index
    %233 = vector.load %arg5[%c2_100, %c0_101, %c0_102] : memref<4x32x3xf32, #tpu.memory_space<vmem>>, vector<1x32x3xf32>
    %234 = vector.shape_cast %233 : vector<1x32x3xf32> to vector<32x3xf32>
    %cst_103 = arith.constant 0.000000e+00 : f32
    %235 = vector.broadcast %cst_103 : f32 to vector<32x128xf32>
    %c4_i32 = arith.constant 4 : i32
    %236 = tpu.dynamic_rotate %232 by %c4_i32 dim 1 : vector<32x128xf32>, i32 -> vector<32x128xf32>
    %c4_i32_104 = arith.constant 4 : i32
    %237 = vector.broadcast %c4_i32_104 : i32 to vector<1x128xi32>
    %238 = arith.cmpi sge, %2, %237 : vector<1x128xi32>
    %cst_105 = arith.constant 0.000000e+00 : f32
    %239 = vector.shape_cast %238 : vector<1x128xi1> to vector<1x128xi1>
    %240 = vector.broadcast %239 : vector<1x128xi1> to vector<32x128xi1>
    %241 = vector.broadcast %cst_105 : f32 to vector<32x128xf32>
    %242 = arith.select %240, %236, %241 : vector<32x128xi1>, vector<32x128xf32>
    %243 = vector.extract_strided_slice %234 {offsets = [0, 0], sizes = [32, 1], strides = [1, 1]} : vector<32x3xf32> to vector<32x1xf32>
    %244 = vector.broadcast %243 : vector<32x1xf32> to vector<32x128xf32>
    %245 = arith.mulf %244, %242 : vector<32x128xf32>
    %246 = arith.addf %235, %245 : vector<32x128xf32>
    %247 = vector.extract_strided_slice %234 {offsets = [0, 1], sizes = [32, 1], strides = [1, 1]} : vector<32x3xf32> to vector<32x1xf32>
    %248 = vector.broadcast %247 : vector<32x1xf32> to vector<32x128xf32>
    %249 = arith.mulf %248, %232 : vector<32x128xf32>
    %250 = arith.addf %246, %249 : vector<32x128xf32>
    %c124_i32 = arith.constant 124 : i32
    %251 = tpu.dynamic_rotate %232 by %c124_i32 dim 1 : vector<32x128xf32>, i32 -> vector<32x128xf32>
    %c124_i32_106 = arith.constant 124 : i32
    %252 = vector.broadcast %c124_i32_106 : i32 to vector<1x128xi32>
    %253 = arith.cmpi slt, %2, %252 : vector<1x128xi32>
    %cst_107 = arith.constant 0.000000e+00 : f32
    %254 = vector.shape_cast %253 : vector<1x128xi1> to vector<1x128xi1>
    %255 = vector.broadcast %254 : vector<1x128xi1> to vector<32x128xi1>
    %256 = vector.broadcast %cst_107 : f32 to vector<32x128xf32>
    %257 = arith.select %255, %251, %256 : vector<32x128xi1>, vector<32x128xf32>
    %258 = vector.extract_strided_slice %234 {offsets = [0, 2], sizes = [32, 1], strides = [1, 1]} : vector<32x3xf32> to vector<32x1xf32>
    %259 = vector.broadcast %258 : vector<32x1xf32> to vector<32x128xf32>
    %260 = arith.mulf %259, %257 : vector<32x128xf32>
    %261 = arith.addf %250, %260 : vector<32x128xf32>
    %c2_108 = arith.constant 2 : index
    %262 = memref.load %arg10[%c2_108] : memref<4xf32, #tpu.memory_space<smem>>
    %cst_109 = arith.constant 0.000000e+00 : f32
    %263 = vector.broadcast %cst_109 : f32 to vector<32x128xf32>
    %264 = arith.cmpf oge, %261, %263 : vector<32x128xf32>
    %265 = vector.broadcast %262 : f32 to vector<32x128xf32>
    %266 = arith.mulf %265, %261 : vector<32x128xf32>
    %267 = arith.select %264, %261, %266 : vector<32x128xi1>, vector<32x128xf32>
    %c2_110 = arith.constant 2 : index
    %c0_111 = arith.constant 0 : index
    %c0_112 = arith.constant 0 : index
    %268 = vector.load %arg6[%c2_110, %c0_111, %c0_112] : memref<4x32x1xf32, #tpu.memory_space<vmem>>, vector<1x32x1xf32>
    %269 = vector.shape_cast %268 : vector<1x32x1xf32> to vector<32x1xf32>
    %c2_113 = arith.constant 2 : index
    %c0_114 = arith.constant 0 : index
    %c0_115 = arith.constant 0 : index
    %270 = vector.load %arg7[%c2_113, %c0_114, %c0_115] : memref<4x32x1xf32, #tpu.memory_space<vmem>>, vector<1x32x1xf32>
    %271 = vector.shape_cast %270 : vector<1x32x1xf32> to vector<32x1xf32>
    %272 = vector.shape_cast %267 : vector<32x128xf32> to vector<1x32x128xf32>
    %cst_116 = arith.constant dense<0.000000e+00> : vector<1xf32>
    %273 = vector.multi_reduction <add>, %272, %cst_116 [1, 2] : vector<1x32x128xf32> to vector<1xf32>
    %274 = vector.shape_cast %273 : vector<1xf32> to vector<1x1x1xf32>
    %275 = vector.extract %274[0, 0, 0] : f32 from vector<1x1x1xf32>
    %cst_117 = arith.constant 2.44140625E-4 : f32
    %276 = arith.mulf %275, %cst_117 : f32
    %277 = vector.broadcast %276 : f32 to vector<32x128xf32>
    %278 = arith.subf %267, %277 : vector<32x128xf32>
    %279 = arith.mulf %278, %278 : vector<32x128xf32>
    %280 = vector.shape_cast %279 : vector<32x128xf32> to vector<1x32x128xf32>
    %cst_118 = arith.constant dense<0.000000e+00> : vector<1xf32>
    %281 = vector.multi_reduction <add>, %280, %cst_118 [1, 2] : vector<1x32x128xf32> to vector<1xf32>
    %282 = vector.shape_cast %281 : vector<1xf32> to vector<1x1x1xf32>
    %283 = vector.extract %282[0, 0, 0] : f32 from vector<1x1x1xf32>
    %cst_119 = arith.constant 2.44140625E-4 : f32
    %284 = arith.mulf %283, %cst_119 : f32
    %cst_120 = arith.constant 9.99999993E-9 : f32
    %285 = arith.addf %284, %cst_120 : f32
    %286 = math.rsqrt %285 : f32
    %287 = vector.broadcast %286 : f32 to vector<32x1xf32>
    %288 = arith.mulf %269, %287 : vector<32x1xf32>
    %289 = vector.broadcast %288 : vector<32x1xf32> to vector<32x128xf32>
    %290 = arith.mulf %278, %289 : vector<32x128xf32>
    %291 = vector.broadcast %271 : vector<32x1xf32> to vector<32x128xf32>
    %292 = arith.addf %290, %291 : vector<32x128xf32>
    %c2_121 = arith.constant 2 : index
    %c0_122 = arith.constant 0 : index
    %c0_123 = arith.constant 0 : index
    %293 = vector.load %arg8[%c2_121, %c0_122, %c0_123] : memref<4x16x32xf32, #tpu.memory_space<vmem>>, vector<1x16x32xf32>
    %294 = vector.shape_cast %293 : vector<1x16x32xf32> to vector<16x32xf32>
    %cst_124 = arith.constant dense<0.000000e+00> : vector<16x128xf32>
    %295 = tpu.matmul %294, %292, %cst_124 {dimension_numbers = #tpu.dot_dimension_numbers<[1], [0], [0], [1], [0, 0, 1, 1], [], []>} : vector<16x32xf32>, vector<32x128xf32>, vector<16x128xf32> -> vector<16x128xf32>
    %296 = arith.addf %198, %295 : vector<16x128xf32>
    %c3 = arith.constant 3 : index
    %c0_125 = arith.constant 0 : index
    %c0_126 = arith.constant 0 : index
    %297 = vector.load %arg2[%c3, %c0_125, %c0_126] : memref<4x32x16xf32, #tpu.memory_space<vmem>>, vector<1x32x16xf32>
    %298 = vector.shape_cast %297 : vector<1x32x16xf32> to vector<32x16xf32>
    %cst_127 = arith.constant dense<0.000000e+00> : vector<32x128xf32>
    %299 = tpu.matmul %298, %296, %cst_127 {dimension_numbers = #tpu.dot_dimension_numbers<[1], [0], [0], [1], [0, 0, 1, 1], [], []>} : vector<32x16xf32>, vector<16x128xf32>, vector<32x128xf32> -> vector<32x128xf32>
    %c3_128 = arith.constant 3 : index
    %300 = memref.load %arg9[%c3_128] : memref<4xf32, #tpu.memory_space<smem>>
    %cst_129 = arith.constant 0.000000e+00 : f32
    %301 = vector.broadcast %cst_129 : f32 to vector<32x128xf32>
    %302 = arith.cmpf oge, %299, %301 : vector<32x128xf32>
    %303 = vector.broadcast %300 : f32 to vector<32x128xf32>
    %304 = arith.mulf %303, %299 : vector<32x128xf32>
    %305 = arith.select %302, %299, %304 : vector<32x128xi1>, vector<32x128xf32>
    %c3_130 = arith.constant 3 : index
    %c0_131 = arith.constant 0 : index
    %c0_132 = arith.constant 0 : index
    %306 = vector.load %arg3[%c3_130, %c0_131, %c0_132] : memref<4x32x1xf32, #tpu.memory_space<vmem>>, vector<1x32x1xf32>
    %307 = vector.shape_cast %306 : vector<1x32x1xf32> to vector<32x1xf32>
    %c3_133 = arith.constant 3 : index
    %c0_134 = arith.constant 0 : index
    %c0_135 = arith.constant 0 : index
    %308 = vector.load %arg4[%c3_133, %c0_134, %c0_135] : memref<4x32x1xf32, #tpu.memory_space<vmem>>, vector<1x32x1xf32>
    %309 = vector.shape_cast %308 : vector<1x32x1xf32> to vector<32x1xf32>
    %310 = vector.shape_cast %305 : vector<32x128xf32> to vector<1x32x128xf32>
    %cst_136 = arith.constant dense<0.000000e+00> : vector<1xf32>
    %311 = vector.multi_reduction <add>, %310, %cst_136 [1, 2] : vector<1x32x128xf32> to vector<1xf32>
    %312 = vector.shape_cast %311 : vector<1xf32> to vector<1x1x1xf32>
    %313 = vector.extract %312[0, 0, 0] : f32 from vector<1x1x1xf32>
    %cst_137 = arith.constant 2.44140625E-4 : f32
    %314 = arith.mulf %313, %cst_137 : f32
    %315 = vector.broadcast %314 : f32 to vector<32x128xf32>
    %316 = arith.subf %305, %315 : vector<32x128xf32>
    %317 = arith.mulf %316, %316 : vector<32x128xf32>
    %318 = vector.shape_cast %317 : vector<32x128xf32> to vector<1x32x128xf32>
    %cst_138 = arith.constant dense<0.000000e+00> : vector<1xf32>
    %319 = vector.multi_reduction <add>, %318, %cst_138 [1, 2] : vector<1x32x128xf32> to vector<1xf32>
    %320 = vector.shape_cast %319 : vector<1xf32> to vector<1x1x1xf32>
    %321 = vector.extract %320[0, 0, 0] : f32 from vector<1x1x1xf32>
    %cst_139 = arith.constant 2.44140625E-4 : f32
    %322 = arith.mulf %321, %cst_139 : f32
    %cst_140 = arith.constant 9.99999993E-9 : f32
    %323 = arith.addf %322, %cst_140 : f32
    %324 = math.rsqrt %323 : f32
    %325 = vector.broadcast %324 : f32 to vector<32x1xf32>
    %326 = arith.mulf %307, %325 : vector<32x1xf32>
    %327 = vector.broadcast %326 : vector<32x1xf32> to vector<32x128xf32>
    %328 = arith.mulf %316, %327 : vector<32x128xf32>
    %329 = vector.broadcast %309 : vector<32x1xf32> to vector<32x128xf32>
    %330 = arith.addf %328, %329 : vector<32x128xf32>
    %c3_141 = arith.constant 3 : index
    %c0_142 = arith.constant 0 : index
    %c0_143 = arith.constant 0 : index
    %331 = vector.load %arg5[%c3_141, %c0_142, %c0_143] : memref<4x32x3xf32, #tpu.memory_space<vmem>>, vector<1x32x3xf32>
    %332 = vector.shape_cast %331 : vector<1x32x3xf32> to vector<32x3xf32>
    %cst_144 = arith.constant 0.000000e+00 : f32
    %333 = vector.broadcast %cst_144 : f32 to vector<32x128xf32>
    %c8_i32 = arith.constant 8 : i32
    %334 = tpu.dynamic_rotate %330 by %c8_i32 dim 1 : vector<32x128xf32>, i32 -> vector<32x128xf32>
    %c8_i32_145 = arith.constant 8 : i32
    %335 = vector.broadcast %c8_i32_145 : i32 to vector<1x128xi32>
    %336 = arith.cmpi sge, %2, %335 : vector<1x128xi32>
    %cst_146 = arith.constant 0.000000e+00 : f32
    %337 = vector.shape_cast %336 : vector<1x128xi1> to vector<1x128xi1>
    %338 = vector.broadcast %337 : vector<1x128xi1> to vector<32x128xi1>
    %339 = vector.broadcast %cst_146 : f32 to vector<32x128xf32>
    %340 = arith.select %338, %334, %339 : vector<32x128xi1>, vector<32x128xf32>
    %341 = vector.extract_strided_slice %332 {offsets = [0, 0], sizes = [32, 1], strides = [1, 1]} : vector<32x3xf32> to vector<32x1xf32>
    %342 = vector.broadcast %341 : vector<32x1xf32> to vector<32x128xf32>
    %343 = arith.mulf %342, %340 : vector<32x128xf32>
    %344 = arith.addf %333, %343 : vector<32x128xf32>
    %345 = vector.extract_strided_slice %332 {offsets = [0, 1], sizes = [32, 1], strides = [1, 1]} : vector<32x3xf32> to vector<32x1xf32>
    %346 = vector.broadcast %345 : vector<32x1xf32> to vector<32x128xf32>
    %347 = arith.mulf %346, %330 : vector<32x128xf32>
    %348 = arith.addf %344, %347 : vector<32x128xf32>
    %c120_i32 = arith.constant 120 : i32
    %349 = tpu.dynamic_rotate %330 by %c120_i32 dim 1 : vector<32x128xf32>, i32 -> vector<32x128xf32>
    %c120_i32_147 = arith.constant 120 : i32
    %350 = vector.broadcast %c120_i32_147 : i32 to vector<1x128xi32>
    %351 = arith.cmpi slt, %2, %350 : vector<1x128xi32>
    %cst_148 = arith.constant 0.000000e+00 : f32
    %352 = vector.shape_cast %351 : vector<1x128xi1> to vector<1x128xi1>
    %353 = vector.broadcast %352 : vector<1x128xi1> to vector<32x128xi1>
    %354 = vector.broadcast %cst_148 : f32 to vector<32x128xf32>
    %355 = arith.select %353, %349, %354 : vector<32x128xi1>, vector<32x128xf32>
    %356 = vector.extract_strided_slice %332 {offsets = [0, 2], sizes = [32, 1], strides = [1, 1]} : vector<32x3xf32> to vector<32x1xf32>
    %357 = vector.broadcast %356 : vector<32x1xf32> to vector<32x128xf32>
    %358 = arith.mulf %357, %355 : vector<32x128xf32>
    %359 = arith.addf %348, %358 : vector<32x128xf32>
    %c3_149 = arith.constant 3 : index
    %360 = memref.load %arg10[%c3_149] : memref<4xf32, #tpu.memory_space<smem>>
    %cst_150 = arith.constant 0.000000e+00 : f32
    %361 = vector.broadcast %cst_150 : f32 to vector<32x128xf32>
    %362 = arith.cmpf oge, %359, %361 : vector<32x128xf32>
    %363 = vector.broadcast %360 : f32 to vector<32x128xf32>
    %364 = arith.mulf %363, %359 : vector<32x128xf32>
    %365 = arith.select %362, %359, %364 : vector<32x128xi1>, vector<32x128xf32>
    %c3_151 = arith.constant 3 : index
    %c0_152 = arith.constant 0 : index
    %c0_153 = arith.constant 0 : index
    %366 = vector.load %arg6[%c3_151, %c0_152, %c0_153] : memref<4x32x1xf32, #tpu.memory_space<vmem>>, vector<1x32x1xf32>
    %367 = vector.shape_cast %366 : vector<1x32x1xf32> to vector<32x1xf32>
    %c3_154 = arith.constant 3 : index
    %c0_155 = arith.constant 0 : index
    %c0_156 = arith.constant 0 : index
    %368 = vector.load %arg7[%c3_154, %c0_155, %c0_156] : memref<4x32x1xf32, #tpu.memory_space<vmem>>, vector<1x32x1xf32>
    %369 = vector.shape_cast %368 : vector<1x32x1xf32> to vector<32x1xf32>
    %370 = vector.shape_cast %365 : vector<32x128xf32> to vector<1x32x128xf32>
    %cst_157 = arith.constant dense<0.000000e+00> : vector<1xf32>
    %371 = vector.multi_reduction <add>, %370, %cst_157 [1, 2] : vector<1x32x128xf32> to vector<1xf32>
    %372 = vector.shape_cast %371 : vector<1xf32> to vector<1x1x1xf32>
    %373 = vector.extract %372[0, 0, 0] : f32 from vector<1x1x1xf32>
    %cst_158 = arith.constant 2.44140625E-4 : f32
    %374 = arith.mulf %373, %cst_158 : f32
    %375 = vector.broadcast %374 : f32 to vector<32x128xf32>
    %376 = arith.subf %365, %375 : vector<32x128xf32>
    %377 = arith.mulf %376, %376 : vector<32x128xf32>
    %378 = vector.shape_cast %377 : vector<32x128xf32> to vector<1x32x128xf32>
    %cst_159 = arith.constant dense<0.000000e+00> : vector<1xf32>
    %379 = vector.multi_reduction <add>, %378, %cst_159 [1, 2] : vector<1x32x128xf32> to vector<1xf32>
    %380 = vector.shape_cast %379 : vector<1xf32> to vector<1x1x1xf32>
    %381 = vector.extract %380[0, 0, 0] : f32 from vector<1x1x1xf32>
    %cst_160 = arith.constant 2.44140625E-4 : f32
    %382 = arith.mulf %381, %cst_160 : f32
    %cst_161 = arith.constant 9.99999993E-9 : f32
    %383 = arith.addf %382, %cst_161 : f32
    %384 = math.rsqrt %383 : f32
    %385 = vector.broadcast %384 : f32 to vector<32x1xf32>
    %386 = arith.mulf %367, %385 : vector<32x1xf32>
    %387 = vector.broadcast %386 : vector<32x1xf32> to vector<32x128xf32>
    %388 = arith.mulf %376, %387 : vector<32x128xf32>
    %389 = vector.broadcast %369 : vector<32x1xf32> to vector<32x128xf32>
    %390 = arith.addf %388, %389 : vector<32x128xf32>
    %c3_162 = arith.constant 3 : index
    %c0_163 = arith.constant 0 : index
    %c0_164 = arith.constant 0 : index
    %391 = vector.load %arg8[%c3_162, %c0_163, %c0_164] : memref<4x16x32xf32, #tpu.memory_space<vmem>>, vector<1x16x32xf32>
    %392 = vector.shape_cast %391 : vector<1x16x32xf32> to vector<16x32xf32>
    %cst_165 = arith.constant dense<0.000000e+00> : vector<16x128xf32>
    %393 = tpu.matmul %392, %390, %cst_165 {dimension_numbers = #tpu.dot_dimension_numbers<[1], [0], [0], [1], [0, 0, 1, 1], [], []>} : vector<16x32xf32>, vector<32x128xf32>, vector<16x128xf32> -> vector<16x128xf32>
    %394 = arith.addf %296, %393 : vector<16x128xf32>
    %c0_166 = arith.constant 0 : index
    %c0_167 = arith.constant 0 : index
    %c0_168 = arith.constant 0 : index
    %395 = vector.load %arg11[%c0_166, %c0_167, %c0_168] : memref<1x16x128xf32, #tpu.memory_space<vmem>>, vector<1x16x128xf32>
    %396 = vector.shape_cast %395 : vector<1x16x128xf32> to vector<16x128xf32>
    %397 = vector.shape_cast %394 : vector<16x128xf32> to vector<1x16x128xf32>
    tpu.vector_store %arg11[%c0_166, %c0_167, %c0_168], %397 {strides = array<i32>} : memref<1x16x128xf32, #tpu.memory_space<vmem>>, vector<1x16x128xf32>,
    return
  }
  func.func @transform_0(%arg0: i32) -> (i32, i32, i32) {
    %c0_i32 = arith.constant 0 : i32
    %c0_i32_0 = arith.constant 0 : i32
    %c0_i32_1 = arith.constant 0 : i32
    return %arg0, %c0_i32, %c0_i32_0 : i32, i32, i32
  }
  func.func @transform_1(%arg0: i32) -> (i32, i32, i32) {
    %c0_i32 = arith.constant 0 : i32
    %c0_i32_0 = arith.constant 0 : i32
    %c0_i32_1 = arith.constant 0 : i32
    %c0_i32_2 = arith.constant 0 : i32
    return %c0_i32, %c0_i32_0, %c0_i32_1 : i32, i32, i32
  }
  func.func @transform_2(%arg0: i32) -> (i32, i32, i32) {
    %c0_i32 = arith.constant 0 : i32
    %c0_i32_0 = arith.constant 0 : i32
    %c0_i32_1 = arith.constant 0 : i32
    %c0_i32_2 = arith.constant 0 : i32
    return %c0_i32, %c0_i32_0, %c0_i32_1 : i32, i32, i32
  }
  func.func @transform_3(%arg0: i32) -> (i32, i32, i32) {
    %c0_i32 = arith.constant 0 : i32
    %c0_i32_0 = arith.constant 0 : i32
    %c0_i32_1 = arith.constant 0 : i32
    %c0_i32_2 = arith.constant 0 : i32
    return %c0_i32, %c0_i32_0, %c0_i32_1 : i32, i32, i32
  }
  func.func @transform_4(%arg0: i32) -> (i32, i32, i32) {
    %c0_i32 = arith.constant 0 : i32
    %c0_i32_0 = arith.constant 0 : i32
    %c0_i32_1 = arith.constant 0 : i32
    %c0_i32_2 = arith.constant 0 : i32
    return %c0_i32, %c0_i32_0, %c0_i32_1 : i32, i32, i32
  }
  func.func @transform_5(%arg0: i32) -> (i32, i32, i32) {
    %c0_i32 = arith.constant 0 : i32
    %c0_i32_0 = arith.constant 0 : i32
    %c0_i32_1 = arith.constant 0 : i32
    %c0_i32_2 = arith.constant 0 : i32
    return %c0_i32, %c0_i32_0, %c0_i32_1 : i32, i32, i32
  }
  func.func @transform_6(%arg0: i32) -> (i32, i32, i32) {
    %c0_i32 = arith.constant 0 : i32
    %c0_i32_0 = arith.constant 0 : i32
    %c0_i32_1 = arith.constant 0 : i32
    %c0_i32_2 = arith.constant 0 : i32
    return %c0_i32, %c0_i32_0, %c0_i32_1 : i32, i32, i32
  }
  func.func @transform_7(%arg0: i32) -> (i32, i32, i32) {
    %c0_i32 = arith.constant 0 : i32
    %c0_i32_0 = arith.constant 0 : i32
    %c0_i32_1 = arith.constant 0 : i32
    %c0_i32_2 = arith.constant 0 : i32
    return %c0_i32, %c0_i32_0, %c0_i32_1 : i32, i32, i32
  }
  func.func @transform_8(%arg0: i32) -> i32 {
    %c0_i32 = arith.constant 0 : i32
    %c0_i32_0 = arith.constant 0 : i32
    return %c0_i32 : i32
  }
  func.func @transform_9(%arg0: i32) -> i32 {
    %c0_i32 = arith.constant 0 : i32
    %c0_i32_0 = arith.constant 0 : i32
    return %c0_i32 : i32
  }
  func.func @transform_10(%arg0: i32) -> (i32, i32, i32) {
    %c0_i32 = arith.constant 0 : i32
    %c0_i32_0 = arith.constant 0 : i32
    %c0_i32_1 = arith.constant 0 : i32
    return %arg0, %c0_i32, %c0_i32_0 : i32, i32, i32
  }
}

</mosaic_0001>

<bundles_post_ra>
// kernel: tpu_custom_call.1
= control target key start
LH: loop header
LB: loop body
LE: loop exit
PB: predicated region body
PF: predicated region fallthrough
CT: control target
= control target key end

     0   :  { %15 = vsyncpa [#allocation4], 0  ;;  %s4001_s0 = inlined_call_operand.vmem [shape: f32[2,16,128], index: 0, kind: input, shape index: {}]   ;;  %s4002_s1 = inlined_call_operand.vmem [shape: f32[4,32,16], index: 1, kind: input, shape index: {}]   ;;  %s4003_s2 = inlined_call_operand.vmem [shape: f32[4,32,1], index: 2, kind: input, shape index: {}]   ;;  %s4004_s3 = inlined_call_operand.vmem [shape: f32[4,32,1], index: 3, kind: input, shape index: {}]   ;;  %s4005_s4 = inlined_call_operand.vmem [shape: f32[4,32,3], index: 4, kind: input, shape index: {}]   ;;  %s4006_s5 = inlined_call_operand.vmem [shape: f32[4,32,1], index: 5, kind: input, shape index: {}]   ;;  %s4007_s6 = inlined_call_operand.vmem [shape: f32[4,32,1], index: 6, kind: input, shape index: {}]   ;;  %s4008_s7 = inlined_call_operand.vmem [shape: f32[4,16,32], index: 7, kind: input, shape index: {}]   ;;  %s4009_s8 = inlined_call_operand.vmem [shape: f32[4], index: 8, kind: input, shape index: {}]   ;;  %s4010_s9 = inlined_call_operand.vmem [shape: f32[4], index: 9, kind: input, shape index: {}]   ;;  %s4011_s10 = inlined_call_operand.hbm [shape: f32[2,16,128], index: 10, kind: output, shape index: {}]  }
   0x1   :  { %16 = vsyncpa [#allocation6], 0 }
   0x2   :  { %17 = vsyncpa [#allocation3], 0 }
   0x3   :  { %19 = vsyncpa [#allocation3 + $0x1], 0  ;;  %s3264_s13 = smov 0   ;;  %s3266_s14 = smov 0  }
   0x4   :  { %s3268_s15 = smov 0   ;;  %s3270_s16 = smov 0  }
   0x5 LB: > { %s3285_s17 = sadd.s32 4294967295, %s3192_s16   ;;  %s2608_s18 = sadd.s32 4294967294, %s3192_s16   ;;  %s3192_s16 = sphi %s3270_s16, %s4031_s16   ;;  %s3188_s15 = sphi %s3268_s15, %s4030_s15   ;;  %s3184_s14 = sphi %s3266_s14, %s4029_s14   ;;  %s3180_s13 = sphi %s3264_s13, %s4028_s13  }
   0x6   : > { %s3289_s19 = sadd.s32 1, %s3192_s16   ;;  %s247_s20 = sadd.s32 1, %s3188_s15 }
   0x7   : > { %s244_s21 = ssub.s32 %s3192_s16, %s3289_s19  ;;  %p257_p0 = scmp.ne.s32.totalorder %s3188_s15, %s3184_s14 }
   0x8   : > { %p245_p1 = scmp.eq.s32.totalorder %s244_s21, 0  ;;  %p258_p2 = scmp.eq.s32.totalorder %s3285_s17, 1 }
   0x9   : > { %p263_p3 = scmp.ne.s32.totalorder %s3184_s14, %s3180_s13  ;;  %p264_p4 = scmp.eq.s32.totalorder %s2608_s18, 1 }
   0xa   : > { %s3300_s22 = scalar_select %p245_p1, %s3188_s15, %s247_s20  }
   0xb   : > { %p3302_p5 = por %p258_p2, %p257_p0  ;;  %p3306_p6 = por %p264_p4, %p263_p3 }
   0xc   : > { %p2609_p7 = scmp.ge.s32.totalorder %s3192_s16, 1  ;;  %p271_p8 = scmp.lt.s32.totalorder %s3192_s16, 3 }
   0xd   : > { %s4016_s23 = scalar_select %p3302_p5, 1, 0 }
   0xe   : > { %s4017_s24 = scalar_select %p3306_p6, 1, 0 }
   0xf   : > { %p4012_p9 = scmp.eq.s32.totalorder %s3285_s17, 0  ;;  %p3313_p10 = pnand %p2609_p7, %p271_p8 }
  0x10   : > { %s305_s28 = sshll.u32 %s4009_s8, 4  ;;  %s316_s11 = sshll.u32 %s4010_s9, 4  ;;  %s306_s28 = int_to_ptr.vmem [resolvable:$true] %s305_s28  ;;  %s317_s11 = int_to_ptr.vmem [resolvable:$true] %s316_s11 }
  0x11   : > { %s4018_s25 = scalar_select %p3313_p10, 1, 0 }
  0x12   : > { %p2972_p11 = pneg %p3313_p10  ;;  %s3092_s18 = scalar_lea.vmem %s306_s28, 16 }
  0x13   : > { %p3093_p13 = scmp.ne.s32.totalorder %s306_s28, %s3092_s18  ;;  %p3100_p3 = scmp.lt.s32.totalorder %s306_s28, %s306_s28 }
  0x14   : > { %p3327_p12 = pnand %p4012_p9, %p2972_p11  ;;  %p3101_p4 = scmp.lt.s32.totalorder %s3092_s18, %s3092_s18 }
  0x16   : > { %p3094_p0 = pneg %p3327_p12  ;;  %p3102_p7 = por %p3101_p4, %p3100_p3 }
  0x18   : > { %p3095_p1 = pnand %p3094_p0, %p3093_p13 }
  0x1a   : > { %p3096_p2 = pneg %p3095_p1 }
  0x1c   : > { %p3103_p8 = pnand %p3102_p7, %p3096_p2 }
  0x1e   : > { %3106 = shalt.err (!%p3103_p8)
}
  0x1f   : > { %s3194_s20 = smov [#allocation2]   ;;  %s3107_s21 = scalar_lea.vmem %s317_s11, 16 }
  0x20   : > { %2975 = dma.vmem_to_smem (!%p3327_p12), %s306_s28, 16, %s3194_s20, [#allocation4]  }
  0x21   : > { %p3108_p11 = scmp.ne.s32.totalorder %s317_s11, %s3107_s21  ;;  %p3115_p5 = scmp.lt.s32.totalorder %s317_s11, %s317_s11 }
  0x22   : > { %p3116_p10 = scmp.lt.s32.totalorder %s3107_s21, %s3107_s21 }
  0x23   : > { %p3110_p9 = pnand %p3108_p11, %p3094_p0 }
  0x24   : > { %p3117_p13 = por %p3116_p10, %p3115_p5 }
  0x25   : > { %p3111_p6 = pneg %p3110_p9 }
  0x27   : > { %p3118_p1 = pnand %p3117_p13, %p3111_p6 }
  0x29   : > { %3121 = shalt.err (!%p3118_p1)
}
  0x2a   : > { %s3195_s26 = smov [#allocation5]   ;;  %p4020_p2 = scmp.ne.s32.totalorder %s4018_s25, 0 }
  0x2b   : > { %2978 = dma.vmem_to_smem (!%p3327_p12), %s317_s11, 16, %s3195_s26, [#allocation6]  }
  0x2c   : > { %337 = sbr.rel (%p4020_p2) target bundleno = 7474 (0x1d32), region = 60  ;;  %p4021_p3 = scmp.eq.s32.totalorder (!%p4020_p2), %s3285_s17, 0 }
  0x33   : > { %3167 = dma.done.wait (%p4021_p3), [#allocation4], 16   ;;  %p4022_p4 = pmov %p4021_p3 }
  0x34   : > { %p4023_p9 = pmov %p4021_p3 }
  0x35   : > { %3169 = vsyncadd (%p4022_p4), [#allocation4], 4294967280 }
  0x36   : > { %3171 = dma.done.wait (%p4023_p9), [#allocation6], 16   ;;  %p4024_p5 = pmov %p4021_p3 }
  0x38   : > { %3173 = vsyncadd (%p4024_p5), [#allocation6], 4294967280 }
  0x39   : > { %347 = sfence }
  0x3a   : > { %p380_p6 = scmp.lt.s32.totalorder %s3285_s17, 1  ;;  %v389_v0 = vld [vmem:[%s4002_s1] sm:$0xff]  ;;  %vm393_vm0 = vcmask 130048   ;;  %v390_v4 = vld [vmem:[%s4002_s1 + $0x8] sm:$0xff]  ;;  %v391_v5 = vld [vmem:[%s4002_s1 + $0x10] sm:$0xff]  ;;  %v3196_v44 = vmov 0  }
  0x3b   : > { %2786 = vmatprep.mubr.msk.f32.mxu0 %vm393_vm0, %v389_v0  ;;  %v392_v6 = vld [vmem:[%s4002_s1 + $0x18] sm:$0xff]  ;;  %3035 = vset.pattern.permute.xlu0 %v3196_v44  ;;  %v507_v52 = vld [vmem:[%s4003_s2 + $0x10] sm:$0xff]  ;;  %v505_v53 = vld [vmem:[%s4003_s2] sm:$0xff]  ;;  %v3197_v60 = vmov 2   ;;  %v3198_v0 = vmov 1   ;;  %s3199_s27 = smov 1  }
  0x3c   : > { %s381_s25 = scalar_select %p380_p6, %s3285_s17, 1  ;;  %3034 = vset.pattern.permute.xlu1 %v3196_v44  ;;  %v506_v57 = vld [vmem:[%s4003_s2 + $0x8] sm:$0xff]  ;;  %v605_v59 = vld [vmem:[%s4005_s4] sm:$0xff]  ;;  %v608_v62 = vld [vmem:[%s4005_s4 + $0x18] sm:$0xff]  ;;  %vm831_vm11 = vcmask 261120  }
  0x3d   : > { %v509_v61 = vld [vmem:[%s4004_s3] sm:$0xff]  ;;  %v510_v63 = vld [vmem:[%s4004_s3 + $0x8] sm:$0xff]  ;;  %p4025_p12 = scmp.ne.s32.totalorder %s4016_s23, 0 }
  0x3e   : > { %s2732_s29 = sshll.u32 %s381_s25, 4  ;;  %s491_s25 = sld [smem:[#allocation2]] }
  0x3f   : > { %s384_s12 = scalar_lea.vmem %s4001_s0, %s2732_s29 }
  0x40   : > { %v3356_v1 = vld [vmem:[%s384_s12] sm:$0xff]  ;;  %v3358_v2 = vld [vmem:[%s384_s12 + $0x8] sm:$0xff] }
  0x41   : > { %v2866_v3 = vpack.c.bf16 %v3358_v2, %v3356_v1 }
  0x43   : > { %2867 = vmatprep.subr.bf16.mxu0 %v2866_v3 }
  0x44   : > { %2869 = vmatpush3.bf16.msra.mxu0 %v2866_v3  ;;  %v496_v7 = vstv %s491_s25  ;;  %v511_v3 = vld [vmem:[%s4004_s3 + $0x10] sm:$0xff]  ;;  %s715_s25 = sld [smem:[#allocation5]] }
  0x47   : > { %2787 = vmatmul.mubr.msk.f32.vlgmr.msra.gmra.mrb[0].mxu0 %vm393_vm0, %v390_v4  ;;  %v508_v4 = vld [vmem:[%s4003_s2 + $0x18] sm:$0xff] }
  0x48   : > { %2789 = vmatprep.mubr.msk.f32.mxu0 %vm393_vm0, %v391_v5 }
  0x4b   : > { %2790 = vmatmul.mubr.msk.f32.gmra.mrb[2].mxu0 %vm393_vm0, %v392_v6  ;;  %v512_v6 = vld [vmem:[%s4004_s3 + $0x18] sm:$0xff] }
 0x11a   : > { %v2788_v8 = vpop.f32.mrb[0].mxu0 }
 0x11b   : > { %vm493_vm1 = vcmp.ge.f32.partialorder %v2788_v8, 0.0  ;;  %v498_v9 = vmul.f32 %v2788_v8, %v496_v7  ;;  %v472_v10 = vpop.f32.mrb[1].mxu0 }
 0x11c   : > { %vm492_vm2 = vcmp.ge.f32.partialorder %v472_v10, 0.0  ;;  %v497_v11 = vmul.f32 %v496_v7, %v472_v10 }
 0x11d   : > { %v502_v12 = vsel %vm493_vm1, %v2788_v8, %v498_v9  ;;  %v607_v8 = vld [vmem:[%s4005_s4 + $0x10] sm:$0xff] }
 0x11e   : > { %v501_v13 = vsel %vm492_vm2, %v472_v10, %v497_v11  ;;  %v2791_v14 = vpop.f32.mrb[2].mxu0 }
 0x11f   : > { %v482_v15 = vpop.f32.mrb[3].mxu0  ;;  %v500_v16 = vmul.f32 %v2791_v14, %v496_v7  ;;  %vm495_vm4 = vcmp.ge.f32.partialorder %v2791_v14, 0.0  ;;  %v513_v18 = vadd.f32 %v502_v12, %v501_v13 }
 0x120   : > { %vm494_vm3 = vcmp.ge.f32.partialorder %v482_v15, 0.0  ;;  %v499_v17 = vmul.f32 %v496_v7, %v482_v15  ;;  %v606_v7 = vld [vmem:[%s4005_s4 + $0x8] sm:$0xff] }
 0x121   : > { %v504_v21 = vsel %vm495_vm4, %v2791_v14, %v500_v16 }
 0x122   : > { %v503_v19 = vsel %vm494_vm3, %v482_v15, %v499_v17 }
 0x123   : > { %v514_v20 = vadd.f32 %v513_v18, %v503_v19 }
 0x125   : > { %v515_v22 = vadd.f32 %v514_v20, %v504_v21 }
 0x127   : > { %516 = vadd.xlane.f32.xlu0 %v515_v22 }
 0x1b4   : > { %v517_v23 = vpop.xlane.xlu0 %516 }
 0x1b5   : > { %v518_v24 = vrot.slane %v517_v23, 4 }
 0x1b7   : > { %v519_v25 = vadd.f32 %v518_v24, %v517_v23 }
 0x1b9   : > { %v520_v26 = vrot.slane %v519_v25, 2 }
 0x1bb   : > { %v521_v27 = vadd.f32 %v520_v26, %v519_v25 }
 0x1bd   : > { %v522_v28 = vrot.slane %v521_v27, 1 }
 0x1bf   : > { %v523_v29 = vadd.f32 %v522_v28, %v521_v27 }
 0x1c1   : > { %2914 = vpush %v523_v29 }
 0x1f2   : > { %s2915_s29 = spop %2914 }
 0x1f3   : > { %s525_s30 = smul.f32 0.00024414063, %s2915_s29 }
 0x1f5   : > { %v526_v30 = vstv %s525_s30 }
 0x1f6   : > { %v3374_v31 = vsub.f32 %v501_v13, %v526_v30  ;;  %v3376_v32 = vsub.f32 %v502_v12, %v526_v30  ;;  %v3378_v33 = vsub.f32 %v503_v19, %v526_v30  ;;  %v3380_v34 = vsub.f32 %v504_v21, %v526_v30 }
 0x1f8   : > { %v531_v35 = vmul.f32 %v3374_v31, %v3374_v31  ;;  %v532_v36 = vmul.f32 %v3376_v32, %v3376_v32  ;;  %v533_v37 = vmul.f32 %v3378_v33, %v3378_v33  ;;  %v534_v39 = vmul.f32 %v3380_v34, %v3380_v34 }
 0x1fa   : > { %v535_v38 = vadd.f32 %v532_v36, %v531_v35 }
 0x1fc   : > { %v536_v40 = vadd.f32 %v535_v38, %v533_v37  ;;  %v387_v37 = vlaneseq }
 0x1fe   : > { %v537_v41 = vadd.f32 %v536_v40, %v534_v39 }
 0x200   : > { %538 = vadd.xlane.f32.xlu0 %v537_v41 }
 0x28d   : > { %v539_v42 = vpop.xlane.xlu0 %538 }
 0x28e   : > { %v540_v43 = vrot.slane %v539_v42, 4 }
 0x290   : > { %v541_v45 = vadd.f32 %v540_v43, %v539_v42 }
 0x292   : > { %v542_v46 = vrot.slane %v541_v45, 2 }
 0x294   : > { %v543_v47 = vadd.f32 %v542_v46, %v541_v45 }
 0x296   : > { %v544_v48 = vrot.slane %v543_v47, 1 }
 0x298   : > { %v545_v49 = vadd.f32 %v544_v48, %v543_v47 }
 0x29a   : > { %2916 = vpush %v545_v49 }
 0x2cb   : > { %s2917_s11 = spop %2916 }
 0x2cc   : > { %s547_s12 = smul.f32 0.00024414063, %s2917_s11 }
 0x2ce   : > { %s548_s18 = sadd.f32 1e-08, %s547_s12 }
 0x2d0   : > { %v549_v50 = vstv %s548_s18 }
 0x2d1   : > { %3076 = vrsqrt.f32 %v549_v50 }
 0x2db   : > { %v3077_v51 = vpop.eup %3076 }
 0x2dc   : > { %2918 = vpush %v3077_v51 }
 0x30d   : > { %s2919_s28 = spop %2918 }
 0x30e   : > { %v552_v54 = vstv %s2919_s28  ;;  %s3200_s28 = smov 127  }
 0x30f   : > { %v555_v55 = vmul.f32 %v552_v54, %v507_v52  ;;  %v553_v56 = vmul.f32 %v552_v54, %v505_v53  ;;  %v554_v58 = vmul.f32 %v552_v54, %v506_v57  ;;  %v556_v5 = vmul.f32 %v552_v54, %v508_v4 }
 0x310   : > { %v720_v4 = vstv %s715_s25 }
 0x311   : > { %569 = vperm.xlu0 %3035, %v555_v55   ;;  %559 = vperm.xlu1 %3034, %v553_v56  }
 0x315   : > { %564 = vperm.xlu1 %3034, %v554_v58   ;;  %3039 = vset.pattern.permute.xlu0 %v3197_v60 }
 0x316   : > { %692 = vperm.xlu0 %3039, %v605_v59  }
 0x319   : > { %583 = vperm.xlu1 %3034, %v509_v61  }
 0x31a   : > { %3042 = vset.pattern.permute.xlu0 %v3198_v0 }
 0x31b   : > { %665 = vperm.xlu0 %3042, %v608_v62  }
 0x31d   : > { %588 = vperm.xlu1 %3034, %v510_v63  }
 0x31f   : > { %3044 = vset.pattern.permute.xlu0 %v3196_v44 }
 0x321   : > { %593 = vperm.xlu1 %3034, %v511_v3  }
 0x325   : > { %574 = vperm.xlu1 %3034, %v556_v5  }
 0x329   : > { %598 = vperm.xlu1 %3034, %v512_v6  }
 0x32d   : > { %626 = vperm.xlu1 %3034, %v605_v59  }
 0x331   : > { %631 = vperm.xlu1 %3034, %v606_v7  }
 0x335   : > { %3036 = vset.pattern.permute.xlu1 %v3198_v0 }
 0x336   : > { %653 = vperm.xlu1 %3036, %v605_v59  }
 0x33a   : > { %657 = vperm.xlu1 %3036, %v606_v7  }
 0x33e   : > { %3037 = vset.pattern.permute.xlu1 %v3196_v44 }
 0x33f   : > { %636 = vperm.xlu1 %3037, %v607_v8  }
 0x343   : > { %3038 = vset.pattern.permute.xlu1 %v3198_v0 }
 0x344   : > { %661 = vperm.xlu1 %3038, %v607_v8  }
 0x348   : > { %3040 = vset.pattern.permute.xlu1 %v3197_v60 }
 0x349   : > { %696 = vperm.xlu1 %3040, %v606_v7  }
 0x34d   : > { %3041 = vset.pattern.permute.xlu1 %v3196_v44 }
 0x34e   : > { %641 = vperm.xlu1 %3041, %v608_v62  }
 0x352   : > { %3043 = vset.pattern.permute.xlu1 %v3197_v60 }
 0x353   : > { %700 = vperm.xlu1 %3043, %v607_v8  }
 0x357   : > { %704 = vperm.xlu1 %3043, %v608_v62  }
 0x35b   : > { %3045 = vset.pattern.permute.xlu1 %v3196_v44 }
 0x390   : > { %v560_v9 = vpop.permute.xlu1 %559  ;;  %v570_v15 = vpop.permute.xlu0 %569 }
 0x391   : > { %v577_v11 = vmul.f32 %v560_v9, %v3374_v31  ;;  %v579_v18 = vmul.f32 %v570_v15, %v3378_v33 }
 0x394   : > { %v565_v10 = vpop.permute.xlu1 %564 }
 0x395   : > { %v578_v14 = vmul.f32 %v565_v10, %v3376_v32  ;;  %v693_v35 = vpop.permute.xlu0 %692 }
 0x398   : > { %v584_v12 = vpop.permute.xlu1 %583 }
 0x399   : > { %v601_v13 = vadd.f32 %v584_v12, %v577_v11 }
 0x39a   : > { %v666_v38 = vpop.permute.xlu0 %665 }
 0x39b   : > { %609 = vrot.lane.b32.xlu1 %v601_v13, %s3199_s27 }
 0x39c   : > { %v589_v16 = vpop.permute.xlu1 %588 }
 0x39d   : > { %v602_v17 = vadd.f32 %v589_v16, %v578_v14 }
 0x39f   : > { %676 = vrot.lane.b32.xlu1 %v601_v13, %s3200_s28  ;;  %611 = vrot.lane.b32.xlu0 %v602_v17, %s3199_s27 }
 0x3a0   : > { %v594_v19 = vpop.permute.xlu1 %593 }
 0x3a1   : > { %v603_v20 = vadd.f32 %v594_v19, %v579_v18 }
 0x3a3   : > { %613 = vrot.lane.b32.xlu0 %v603_v20, %s3199_s27 }
 0x3a4   : > { %v575_v21 = vpop.permute.xlu1 %574 }
 0x3a5   : > { %v580_v22 = vmul.f32 %v575_v21, %v3380_v34  ;;  %v3442_v34 = vand.u32 127, %v387_v37 }
 0x3a7   : > { %678 = vrot.lane.b32.xlu0 %v602_v17, %s3200_s28  ;;  %vm617_vm5 = vcmp.ge.s32.totalorder %v3442_v34, 1  ;;  %vm684_vm6 = vcmp.lt.s32.totalorder %v3442_v34, 127  ;;  %vm1146_vm1 = vcmp.ge.s32.totalorder %v3442_v34, 2  ;;  %vm1213_vm2 = vcmp.lt.s32.totalorder %v3442_v34, 126 }
 0x3a8   : > { %v599_v23 = vpop.permute.xlu1 %598 }
 0x3a9   : > { %v604_v24 = vadd.f32 %v599_v23, %v580_v22 }
 0x3ab   : > { %680 = vrot.lane.b32.xlu0 %v603_v20, %s3200_s28  ;;  %615 = vrot.lane.b32.xlu1 %v604_v24, %s3199_s27  ;;  %v671_v11 = vmul.f32 %v666_v38, %v604_v24 }
 0x3ac   : > { %v627_v25 = vpop.permute.xlu1 %626 }
 0x3af   : > { %682 = vrot.lane.b32.xlu1 %v604_v24, %s3200_s28 }
 0x3b0   : > { %v632_v26 = vpop.permute.xlu1 %631 }
 0x3b5   : > { %v654_v27 = vpop.permute.xlu1 %653 }
 0x3b6   : > { %v668_v50 = vmul.f32 %v654_v27, %v601_v13 }
 0x3b9   : > { %v658_v28 = vpop.permute.xlu1 %657 }
 0x3ba   : > { %v669_v51 = vmul.f32 %v658_v28, %v602_v17 }
 0x3be   : > { %v637_v29 = vpop.permute.xlu1 %636 }
 0x3c3   : > { %v662_v30 = vpop.permute.xlu1 %661 }
 0x3c4   : > { %v670_v59 = vmul.f32 %v662_v30, %v603_v20 }
 0x3c8   : > { %v697_v31 = vpop.permute.xlu1 %696 }
 0x3cd   : > { %v642_v32 = vpop.permute.xlu1 %641 }
 0x3d2   : > { %v701_v33 = vpop.permute.xlu1 %700 }
 0x3d6   : > { %v705_v36 = vpop.permute.xlu1 %704 }
 0x40d   : > { %v610_v39 = vpop.permute.xlu1 %609 }
 0x40e   : > { %v620_v42 = vsel %vm617_vm5, %v610_v39, 0.0 }
 0x40f   : > { %v644_v47 = vmul.f32 %v627_v25, %v620_v42 }
 0x411   : > { %v612_v40 = vpop.permute.xlu0 %611  ;;  %v677_v41 = vpop.permute.xlu1 %676  ;;  %v672_v55 = vadd.f32 %v668_v50, %v644_v47  ;;  %v734_v50 = vld [vmem:[%s4007_s6 + $0x8] sm:$0xff] }
 0x412   : > { %v621_v43 = vsel %vm617_vm5, %v612_v40, 0.0  ;;  %v687_v46 = vsel %vm684_vm6, %v677_v41, 0.0 }
 0x413   : > { %v645_v48 = vmul.f32 %v632_v26, %v621_v43  ;;  %v707_v52 = vmul.f32 %v693_v35, %v687_v46 }
 0x415   : > { %v614_v45 = vpop.permute.xlu0 %613  ;;  %v673_v56 = vadd.f32 %v669_v51, %v645_v48  ;;  %v711_v61 = vadd.f32 %v707_v52, %v672_v55  ;;  %v735_v51 = vld [vmem:[%s4007_s6 + $0x10] sm:$0xff] }
 0x416   : > { %v622_v49 = vsel %vm617_vm5, %v614_v45, 0.0 }
 0x417   : > { %v646_v57 = vmul.f32 %v637_v29, %v622_v49  ;;  %v721_v12 = vmul.f32 %v720_v4, %v711_v61  ;;  %vm716_vm8 = vcmp.ge.f32.partialorder %v711_v61, 0.0  ;;  %v733_v49 = vld [vmem:[%s4007_s6] sm:$0xff] }
 0x419   : > { %v679_v53 = vpop.permute.xlu0 %678  ;;  %v674_v7 = vadd.f32 %v670_v59, %v646_v57  ;;  %v725_v21 = vsel %vm716_vm8, %v711_v61, %v721_v12 }
 0x41a   : > { %v688_v54 = vsel %vm684_vm6, %v679_v53, 0.0 }
 0x41b   : > { %v708_v58 = vmul.f32 %v697_v31, %v688_v54 }
 0x41d   : > { %v712_v62 = vadd.f32 %v708_v58, %v673_v56  ;;  %v681_v63 = vpop.permute.xlu0 %680  ;;  %v616_v3 = vpop.permute.xlu1 %615 }
 0x41e   : > { %v689_v5 = vsel %vm684_vm6, %v681_v63, 0.0  ;;  %v623_v6 = vsel %vm617_vm5, %v616_v3, 0.0  ;;  %v729_v63 = vld [vmem:[%s4006_s5] sm:$0xff] }
 0x41f   : > { %v722_v8 = vmul.f32 %v720_v4, %v712_v62  ;;  %v709_v9 = vmul.f32 %v701_v33, %v689_v5  ;;  %v647_v10 = vmul.f32 %v642_v32, %v623_v6  ;;  %vm717_vm7 = vcmp.ge.f32.partialorder %v712_v62, 0.0  ;;  %v731_v6 = vld [vmem:[%s4006_s5 + $0x10] sm:$0xff] }
 0x421   : > { %v713_v13 = vadd.f32 %v709_v9, %v674_v7  ;;  %v683_v14 = vpop.permute.xlu1 %682  ;;  %v675_v15 = vadd.f32 %v671_v11, %v647_v10  ;;  %v726_v19 = vsel %vm717_vm7, %v712_v62, %v722_v8  ;;  %v730_v62 = vld [vmem:[%s4006_s5 + $0x8] sm:$0xff]  ;;  %v732_v8 = vld [vmem:[%s4006_s5 + $0x18] sm:$0xff]  ;;  %v829_v11 = vld [vmem:[%s4008_s7] sm:$0xff] }
 0x422   : > { %v690_v16 = vsel %vm684_vm6, %v683_v14, 0.0  ;;  %v737_v23 = vadd.f32 %v726_v19, %v725_v21  ;;  %v736_v10 = vld [vmem:[%s4007_s6 + $0x18] sm:$0xff]  ;;  %2800 = vmatprep.mubr.msk.f32.mxu1 %vm831_vm11, %v829_v11 }
 0x423   : > { %v710_v17 = vmul.f32 %v705_v36, %v690_v16  ;;  %vm718_vm9 = vcmp.ge.f32.partialorder %v713_v13, 0.0  ;;  %v723_v18 = vmul.f32 %v720_v4, %v713_v13 }
 0x425   : > { %v714_v20 = vadd.f32 %v710_v17, %v675_v15  ;;  %v727_v22 = vsel %vm718_vm9, %v713_v13, %v723_v18 }
 0x426   : > { %v738_v24 = vadd.f32 %v737_v23, %v727_v22 }
 0x427   : > { %vm719_vm10 = vcmp.ge.f32.partialorder %v714_v20, 0.0  ;;  %v724_v25 = vmul.f32 %v720_v4, %v714_v20 }
 0x429   : > { %v728_v26 = vsel %vm719_vm10, %v714_v20, %v724_v25 }
 0x42a   : > { %v739_v27 = vadd.f32 %v738_v24, %v728_v26 }
 0x42c   : > { %740 = vadd.xlane.f32.xlu0 %v739_v27 }
 0x4b9   : > { %v741_v28 = vpop.xlane.xlu0 %740 }
 0x4ba   : > { %v742_v29 = vrot.slane %v741_v28, 4 }
 0x4bc   : > { %v743_v30 = vadd.f32 %v742_v29, %v741_v28 }
 0x4be   : > { %v744_v31 = vrot.slane %v743_v30, 2 }
 0x4c0   : > { %v745_v32 = vadd.f32 %v744_v31, %v743_v30  ;;  %v830_v30 = vld [vmem:[%s4008_s7 + $0x8] sm:$0xff]  ;;  %v2625_v31 = vld [vmem:[%s4002_s1 + $0x20] sm:$0xff] }
 0x4c1   : > { %2807 = vmatprep.mubr.msk.f32.mxu0 %vm393_vm0, %v2625_v31  ;;  %v2637_v31 = vld [vmem:[%s4003_s2 + $0x38] sm:$0xff] }
 0x4c2   : > { %v746_v33 = vrot.slane %v745_v32, 1 }
 0x4c4   : > { %v747_v35 = vadd.f32 %v746_v33, %v745_v32 }
 0x4c6   : > { %2920 = vpush %v747_v35 }
 0x4f7   : > { %s2921_s29 = spop %2920 }
 0x4f8   : > { %s749_s30 = smul.f32 0.00024414063, %s2921_s29  ;;  %s3202_s29 = smov 126  }
 0x4fa   : > { %v750_v36 = vstv %s749_s30  ;;  %s2633_s30 = sld [smem:[#allocation2 + $0x1]] }
 0x4fb   : > { %v751_v37 = vsub.f32 %v725_v21, %v750_v36  ;;  %v752_v38 = vsub.f32 %v726_v19, %v750_v36  ;;  %v3462_v39 = vsub.f32 %v727_v22, %v750_v36  ;;  %v3464_v40 = vsub.f32 %v728_v26, %v750_v36 }
 0x4fd   : > { %v755_v41 = vmul.f32 %v751_v37, %v751_v37  ;;  %v756_v42 = vmul.f32 %v752_v38, %v752_v38  ;;  %v757_v43 = vmul.f32 %v3462_v39, %v3462_v39  ;;  %v758_v46 = vmul.f32 %v3464_v40, %v3464_v40 }
 0x4ff   : > { %v759_v45 = vadd.f32 %v756_v42, %v755_v41 }
 0x501   : > { %v760_v47 = vadd.f32 %v759_v45, %v757_v43 }
 0x503   : > { %v761_v48 = vadd.f32 %v760_v47, %v758_v46 }
 0x505   : > { %762 = vadd.xlane.f32.xlu1 %v761_v48 }
 0x516   : > { %807 = vperm.xlu1 %3045, %v733_v49  }
 0x51a   : > { %812 = vperm.xlu1 %3045, %v734_v50  }
 0x51e   : > { %817 = vperm.xlu1 %3045, %v735_v51  }
 0x592   : > { %v763_v52 = vpop.xlane.xlu1 %762 }
 0x593   : > { %v764_v53 = vrot.slane %v763_v52, 4 }
 0x595   : > { %v765_v54 = vadd.f32 %v764_v53, %v763_v52 }
 0x596   : > { %v808_v12 = vpop.permute.xlu1 %807 }
 0x597   : > { %v766_v55 = vrot.slane %v765_v54, 2 }
 0x599   : > { %v767_v56 = vadd.f32 %v766_v55, %v765_v54 }
 0x59a   : > { %v813_v13 = vpop.permute.xlu1 %812 }
 0x59b   : > { %v768_v57 = vrot.slane %v767_v56, 1 }
 0x59d   : > { %v769_v58 = vadd.f32 %v768_v57, %v767_v56  ;;  %v2639_v56 = vld [vmem:[%s4004_s3 + $0x28] sm:$0xff] }
 0x59e   : > { %v818_v14 = vpop.permute.xlu1 %817 }
 0x59f   : > { %2922 = vpush %v769_v58 }
 0x5d0   : > { %s2923_s27 = spop %2922 }
 0x5d1   : > { %s771_s28 = smul.f32 0.00024414063, %s2923_s27 }
 0x5d3   : > { %s772_s25 = sadd.f32 1e-08, %s771_s28 }
 0x5d5   : > { %v773_v59 = vstv %s772_s25 }
 0x5d6   : > { %3078 = vrsqrt.f32 %v773_v59 }
 0x5e0   : > { %v3079_v61 = vpop.eup %3078 }
 0x5e1   : > { %2924 = vpush %v3079_v61 }
 0x612   : > { %s2925_s18 = spop %2924 }
 0x613   : > { %v776_v3 = vstv %s2925_s18 }
 0x614   : > { %v778_v4 = vmul.f32 %v776_v3, %v730_v62  ;;  %v777_v5 = vmul.f32 %v776_v3, %v729_v63  ;;  %v779_v7 = vmul.f32 %v776_v3, %v731_v6  ;;  %v780_v9 = vmul.f32 %v776_v3, %v732_v8 }
 0x616   : > { %788 = vperm.xlu1 %3045, %v778_v4   ;;  %783 = vperm.xlu0 %3044, %v777_v5  }
 0x61a   : > { %793 = vperm.xlu1 %3045, %v779_v7  }
 0x61e   : > { %798 = vperm.xlu1 %3045, %v780_v9  }
 0x622   : > { %822 = vperm.xlu1 %3045, %v736_v10  }
 0x695   : > { %v784_v15 = vpop.permute.xlu0 %783  ;;  %v789_v16 = vpop.permute.xlu1 %788 }
 0x696   : > { %v801_v17 = vmul.f32 %v784_v15, %v751_v37  ;;  %v802_v18 = vmul.f32 %v789_v16, %v752_v38  ;;  %v2626_v38 = vld [vmem:[%s4002_s1 + $0x28] sm:$0xff]  ;;  %v2638_v16 = vld [vmem:[%s4004_s3 + $0x20] sm:$0xff] }
 0x698   : > { %v825_v19 = vadd.f32 %v808_v12, %v801_v17  ;;  %v826_v20 = vadd.f32 %v813_v13, %v802_v18 }
 0x699   : > { %v794_v21 = vpop.permute.xlu1 %793 }
 0x69a   : > { %v2870_v22 = vpack.c.bf16 %v826_v20, %v825_v19  ;;  %v803_v25 = vmul.f32 %v794_v21, %v3462_v39  ;;  %v2627_v39 = vld [vmem:[%s4002_s1 + $0x30] sm:$0xff] }
 0x69c   : > { %2871 = vmatprep.subr.bf16.mxu1 %v2870_v22  ;;  %v827_v27 = vadd.f32 %v818_v14, %v803_v25 }
 0x69d   : > { %2873 = vmatpush3.bf16.msra.mxu1 %v2870_v22  ;;  %v799_v23 = vpop.permute.xlu1 %798 }
 0x69e   : > { %v804_v24 = vmul.f32 %v799_v23, %v3464_v40 }
 0x6a1   : > { %v823_v26 = vpop.permute.xlu1 %822 }
 0x6a2   : > { %v828_v28 = vadd.f32 %v823_v26, %v804_v24  ;;  %v2635_v26 = vld [vmem:[%s4003_s2 + $0x28] sm:$0xff] }
 0x6a4   : > { %v2874_v29 = vpack.c.bf16 %v828_v28, %v827_v27  ;;  %v2634_v27 = vld [vmem:[%s4003_s2 + $0x20] sm:$0xff] }
 0x6a6   : > { %2875 = vmatprep.subr.bf16.mxu1 %v2874_v29 }
 0x6a7   : > { %2877 = vmatpush3.bf16.msra.mxu1 %v2874_v29 }
 0x6aa   : > { %2801 = vmatmul.mubr.msk.f32.vlgmr.msra.gmra.mrb[0].mxu1 %vm831_vm11, %v830_v30 }
 0x77d   : > { %v2802_v32 = vpop.f32.mrb[0].mxu1 }
 0x77e   : > { %v3509_v33 = vadd.f32 %v2802_v32, %v3358_v2  ;;  %v904_v35 = vpop.f32.mrb[1].mxu1  ;;  %v1022_v2 = vstv %s2633_s30  ;;  %v2636_v32 = vld [vmem:[%s4003_s2 + $0x30] sm:$0xff]  ;;  %s2646_s30 = sld [smem:[#allocation5 + $0x1]] }
 0x77f   : > { %v3512_v36 = vadd.f32 %v904_v35, %v3356_v1  ;;  %v2628_v1 = vld [vmem:[%s4002_s1 + $0x38] sm:$0xff] }
 0x781   : > { %v2878_v37 = vpack.c.bf16 %v3509_v33, %v3512_v36 }
 0x783   : > { %2879 = vmatprep.subr.bf16.mxu0 %v2878_v37 }
 0x784   : > { %2881 = vmatpush3.bf16.msra.mxu0 %v2878_v37 }
 0x787   : > { %2808 = vmatmul.mubr.msk.f32.vlgmr.msra.gmra.mrb[4].mxu0 %vm393_vm0, %v2626_v38  ;;  %v2641_v38 = vld [vmem:[%s4004_s3 + $0x38] sm:$0xff] }
 0x788   : > { %2810 = vmatprep.mubr.msk.f32.mxu0 %vm393_vm0, %v2627_v39  ;;  %v2640_v39 = vld [vmem:[%s4004_s3 + $0x30] sm:$0xff] }
 0x78b   : > { %2811 = vmatmul.mubr.msk.f32.gmra.mrb[6].mxu0 %vm393_vm0, %v2628_v1  ;;  %v2643_v1 = vld [vmem:[%s4005_s4 + $0x28] sm:$0xff] }
 0x85a   : > { %v2809_v40 = vpop.f32.mrb[4].mxu0 }
 0x85b   : > { %vm1019_vm12 = vcmp.ge.f32.partialorder %v2809_v40, 0.0  ;;  %v1024_v41 = vmul.f32 %v2809_v40, %v1022_v2  ;;  %v998_v42 = vpop.f32.mrb[5].mxu0 }
 0x85c   : > { %vm1018_vm13 = vcmp.ge.f32.partialorder %v998_v42, 0.0  ;;  %v1023_v43 = vmul.f32 %v1022_v2, %v998_v42 }
 0x85d   : > { %v1028_v45 = vsel %vm1019_vm12, %v2809_v40, %v1024_v41  ;;  %v2644_v40 = vld [vmem:[%s4005_s4 + $0x30] sm:$0xff]  ;;  %v2645_v41 = vld [vmem:[%s4005_s4 + $0x38] sm:$0xff]  ;;  %vm1677_vm12 = vcmp.ge.s32.totalorder %v3442_v34, 4 }
 0x85e   : > { %v1027_v46 = vsel %vm1018_vm13, %v998_v42, %v1023_v43  ;;  %v2812_v47 = vpop.f32.mrb[6].mxu0  ;;  %vm1744_vm13 = vcmp.lt.s32.totalorder %v3442_v34, 124 }
 0x85f   : > { %v1008_v48 = vpop.f32.mrb[7].mxu0  ;;  %v1026_v49 = vmul.f32 %v2812_v47, %v1022_v2  ;;  %v1041_v51 = vadd.f32 %v1028_v45, %v1027_v46  ;;  %vm1021_vm15 = vcmp.ge.f32.partialorder %v2812_v47, 0.0 }
 0x860   : > { %vm1020_vm14 = vcmp.ge.f32.partialorder %v1008_v48, 0.0  ;;  %v1025_v50 = vmul.f32 %v1022_v2, %v1008_v48  ;;  %v2642_v2 = vld [vmem:[%s4005_s4 + $0x20] sm:$0xff] }
 0x861   : > { %v1030_v54 = vsel %vm1021_vm15, %v2812_v47, %v1026_v49 }
 0x862   : > { %v1029_v52 = vsel %vm1020_vm14, %v1008_v48, %v1025_v50 }
 0x863   : > { %v1042_v53 = vadd.f32 %v1041_v51, %v1029_v52 }
 0x865   : > { %v1043_v55 = vadd.f32 %v1042_v53, %v1030_v54 }
 0x867   : > { %1044 = vadd.xlane.f32.xlu0 %v1043_v55 }
 0x87d   : > { %1116 = vperm.xlu0 %3044, %v2639_v56  }
 0x8f4   : > { %v1045_v57 = vpop.xlane.xlu0 %1044 }
 0x8f5   : > { %v1046_v58 = vrot.slane %v1045_v57, 4 }
 0x8f7   : > { %v1047_v59 = vadd.f32 %v1046_v58, %v1045_v57 }
 0x8f9   : > { %v1048_v61 = vrot.slane %v1047_v59, 2 }
 0x8fb   : > { %v1049_v62 = vadd.f32 %v1048_v61, %v1047_v59 }
 0x8fc   : > { %v1117_v42 = vpop.permute.xlu0 %1116 }
 0x8fd   : > { %v1050_v63 = vrot.slane %v1049_v62, 1 }
 0x8ff   : > { %v1051_v3 = vadd.f32 %v1050_v63, %v1049_v62 }
 0x901   : > { %2926 = vpush %v1051_v3 }
 0x932   : > { %s2927_s18 = spop %2926 }
 0x933   : > { %s1053_s20 = smul.f32 0.00024414063, %s2927_s18 }
 0x935   : > { %v1054_v4 = vstv %s1053_s20 }
 0x936   : > { %v3531_v5 = vsub.f32 %v1027_v46, %v1054_v4  ;;  %v3533_v6 = vsub.f32 %v1028_v45, %v1054_v4  ;;  %v3535_v7 = vsub.f32 %v1029_v52, %v1054_v4  ;;  %v3537_v8 = vsub.f32 %v1030_v54, %v1054_v4 }
 0x938   : > { %v1059_v9 = vmul.f32 %v3531_v5, %v3531_v5  ;;  %v1060_v10 = vmul.f32 %v3533_v6, %v3533_v6  ;;  %v1061_v11 = vmul.f32 %v3535_v7, %v3535_v7  ;;  %v1062_v13 = vmul.f32 %v3537_v8, %v3537_v8 }
 0x93a   : > { %v1063_v12 = vadd.f32 %v1060_v10, %v1059_v9 }
 0x93c   : > { %v1064_v14 = vadd.f32 %v1063_v12, %v1061_v11 }
 0x93e   : > { %v1065_v15 = vadd.f32 %v1064_v14, %v1062_v13 }
 0x940   : > { %1066 = vadd.xlane.f32.xlu1 %v1065_v15 }
 0x951   : > { %1111 = vperm.xlu1 %3045, %v2638_v16  }
 0x9cd   : > { %v1067_v17 = vpop.xlane.xlu1 %1066 }
 0x9ce   : > { %v1068_v18 = vrot.slane %v1067_v17, 4 }
 0x9d0   : > { %v1069_v19 = vadd.f32 %v1068_v18, %v1067_v17 }
 0x9d1   : > { %v1112_v43 = vpop.permute.xlu1 %1111 }
 0x9d2   : > { %v1070_v20 = vrot.slane %v1069_v19, 2 }
 0x9d4   : > { %v1071_v21 = vadd.f32 %v1070_v20, %v1069_v19 }
 0x9d6   : > { %v1072_v22 = vrot.slane %v1071_v21, 1 }
 0x9d8   : > { %v1073_v23 = vadd.f32 %v1072_v22, %v1071_v21 }
 0x9da   : > { %2928 = vpush %v1073_v23 }
 0xa0b   : > { %s2929_s27 = spop %2928 }
 0xa0c   : > { %s1075_s28 = smul.f32 0.00024414063, %s2929_s27 }
 0xa0e   : > { %s1076_s25 = sadd.f32 1e-08, %s1075_s28 }
 0xa10   : > { %v1077_v25 = vstv %s1076_s25  ;;  %s3201_s25 = smov 2  }
 0xa11   : > { %3080 = vrsqrt.f32 %v1077_v25 }
 0xa1b   : > { %v3081_v24 = vpop.eup %3080 }
 0xa1c   : > { %2930 = vpush %v3081_v24 }
 0xa4d   : > { %s2931_s18 = spop %2930 }
 0xa4e   : > { %v1080_v28 = vstv %s2931_s18 }
 0xa4f   : > { %v1082_v29 = vmul.f32 %v2635_v26, %v1080_v28  ;;  %v1081_v30 = vmul.f32 %v2634_v27, %v1080_v28  ;;  %v1084_v35 = vmul.f32 %v2637_v31, %v1080_v28  ;;  %v1083_v37 = vmul.f32 %v2636_v32, %v1080_v28 }
 0xa51   : > { %1092 = vperm.xlu1 %3045, %v1082_v29   ;;  %1087 = vperm.xlu0 %3044, %v1081_v30  }
 0xa55   : > { %1102 = vperm.xlu1 %3045, %v1084_v35   ;;  %1097 = vperm.xlu0 %3044, %v1083_v37   ;;  %v1249_v37 = vstv %s2646_s30 }
 0xa59   : > { %1126 = vperm.xlu1 %3045, %v2641_v38   ;;  %1121 = vperm.xlu0 %3044, %v2640_v39  }
 0xa5d   : > { %1160 = vperm.xlu1 %3045, %v2643_v1   ;;  %3046 = vset.pattern.permute.xlu0 %v3198_v0 }
 0xa5e   : > { %1182 = vperm.xlu0 %3046, %v2642_v2  }
 0xa61   : > { %3047 = vset.pattern.permute.xlu1 %v3198_v0 }
 0xa62   : > { %1186 = vperm.xlu1 %3047, %v2643_v1   ;;  %1190 = vperm.xlu0 %3046, %v2644_v40  }
 0xa66   : > { %3048 = vset.pattern.permute.xlu1 %v3196_v44  ;;  %3050 = vset.pattern.permute.xlu0 %v3197_v60 }
 0xa67   : > { %1165 = vperm.xlu1 %3048, %v2644_v40   ;;  %1225 = vperm.xlu0 %3050, %v2643_v1  }
 0xa6b   : > { %3049 = vset.pattern.permute.xlu1 %v3197_v60  ;;  %1229 = vperm.xlu0 %3050, %v2644_v40  }
 0xa6c   : > { %1221 = vperm.xlu1 %3049, %v2642_v2  }
 0xa6f   : > { %3053 = vset.pattern.permute.xlu0 %v3196_v44 }
 0xa70   : > { %3051 = vset.pattern.permute.xlu1 %v3196_v44  ;;  %1155 = vperm.xlu0 %3053, %v2642_v2  }
 0xa71   : > { %1170 = vperm.xlu1 %3051, %v2645_v41  }
 0xa75   : > { %3052 = vset.pattern.permute.xlu1 %v3198_v0 }
 0xa76   : > { %1194 = vperm.xlu1 %3052, %v2645_v41  }
 0xa7a   : > { %3054 = vset.pattern.permute.xlu1 %v3197_v60 }
 0xa7b   : > { %1233 = vperm.xlu1 %3054, %v2645_v41  }
 0xa7f   : > { %3055 = vset.pattern.permute.xlu1 %v3196_v44 }
 0xad0   : > { %v1093_v45 = vpop.permute.xlu1 %1092  ;;  %v1088_v46 = vpop.permute.xlu0 %1087 }
 0xad1   : > { %v1106_v47 = vmul.f32 %v1093_v45, %v3533_v6  ;;  %v1105_v48 = vmul.f32 %v1088_v46, %v3531_v5 }
 0xad3   : > { %v1130_v49 = vadd.f32 %v1117_v42, %v1106_v47  ;;  %v1129_v50 = vadd.f32 %v1112_v43, %v1105_v48 }
 0xad4   : > { %v1103_v51 = vpop.permute.xlu1 %1102  ;;  %v1098_v52 = vpop.permute.xlu0 %1097 }
 0xad5   : > { %1140 = vrot.lane.b32.xlu0 %v1130_v49, %s3201_s25  ;;  %1138 = vrot.lane.b32.xlu1 %v1129_v50, %s3201_s25  ;;  %v1107_v53 = vmul.f32 %v1098_v52, %v3535_v7  ;;  %v1108_v56 = vmul.f32 %v1103_v51, %v3537_v8 }
 0xad8   : > { %v1127_v54 = vpop.permute.xlu1 %1126  ;;  %v1122_v55 = vpop.permute.xlu0 %1121 }
 0xad9   : > { %v1131_v57 = vadd.f32 %v1122_v55, %v1107_v53  ;;  %1205 = vrot.lane.b32.xlu1 %v1129_v50, %s3202_s29  ;;  %v1132_v58 = vadd.f32 %v1127_v54, %v1108_v56 }
 0xadb   : > { %1142 = vrot.lane.b32.xlu0 %v1131_v57, %s3201_s25 }
 0xadc   : > { %v1161_v59 = vpop.permute.xlu1 %1160 }
 0xadd   : > { %1144 = vrot.lane.b32.xlu1 %v1132_v58, %s3201_s25  ;;  %v1183_v63 = vpop.permute.xlu0 %1182 }
 0xade   : > { %v1197_v19 = vmul.f32 %v1183_v63, %v1129_v50 }
 0xadf   : > { %1207 = vrot.lane.b32.xlu0 %v1130_v49, %s3202_s29 }
 0xae1   : > { %1211 = vrot.lane.b32.xlu1 %v1132_v58, %s3202_s29  ;;  %v1187_v61 = vpop.permute.xlu1 %1186  ;;  %v1191_v4 = vpop.permute.xlu0 %1190 }
 0xae2   : > { %v1198_v26 = vmul.f32 %v1187_v61, %v1130_v49  ;;  %v1199_v1 = vmul.f32 %v1191_v4, %v1131_v57 }
 0xae3   : > { %1209 = vrot.lane.b32.xlu0 %v1131_v57, %s3202_s29 }
 0xae6   : > { %v1166_v62 = vpop.permute.xlu1 %1165  ;;  %v1226_v6 = vpop.permute.xlu0 %1225 }
 0xaea   : > { %v1230_v9 = vpop.permute.xlu0 %1229 }
 0xaeb   : > { %v1222_v3 = vpop.permute.xlu1 %1221 }
 0xaef   : > { %v1156_v10 = vpop.permute.xlu0 %1155 }
 0xaf0   : > { %v1171_v5 = vpop.permute.xlu1 %1170 }
 0xaf5   : > { %v1195_v7 = vpop.permute.xlu1 %1194 }
 0xaf6   : > { %v1200_v32 = vmul.f32 %v1195_v7, %v1132_v58 }
 0xafa   : > { %v1234_v8 = vpop.permute.xlu1 %1233 }
 0xb47   : > { %v1139_v11 = vpop.permute.xlu1 %1138  ;;  %v1141_v13 = vpop.permute.xlu0 %1140 }
 0xb48   : > { %v1149_v12 = vsel %vm1146_vm1, %v1139_v11, 0.0  ;;  %v1150_v16 = vsel %vm1146_vm1, %v1141_v13, 0.0 }
 0xb49   : > { %v1173_v15 = vmul.f32 %v1156_v10, %v1149_v12  ;;  %v1174_v21 = vmul.f32 %v1161_v59, %v1150_v16 }
 0xb4b   : > { %v1206_v14 = vpop.permute.xlu1 %1205  ;;  %v1201_v25 = vadd.f32 %v1197_v19, %v1173_v15  ;;  %v1202_v35 = vadd.f32 %v1198_v26, %v1174_v21  ;;  %v2652_v21 = vld [vmem:[%s4007_s6 + $0x28] sm:$0xff] }
 0xb4c   : > { %v1216_v17 = vsel %vm1213_vm2, %v1206_v14, 0.0 }
 0xb4d   : > { %v1143_v18 = vpop.permute.xlu0 %1142  ;;  %v1236_v20 = vmul.f32 %v1222_v3, %v1216_v17 }
 0xb4e   : > { %v1151_v22 = vsel %vm1146_vm1, %v1143_v18, 0.0 }
 0xb4f   : > { %v1145_v23 = vpop.permute.xlu1 %1144  ;;  %v1240_v29 = vadd.f32 %v1236_v20, %v1201_v25  ;;  %v1175_v30 = vmul.f32 %v1166_v62, %v1151_v22  ;;  %v2651_v20 = vld [vmem:[%s4007_s6 + $0x20] sm:$0xff] }
 0xb50   : > { %v1152_v24 = vsel %vm1146_vm1, %v1145_v23, 0.0 }
 0xb51   : > { %v1176_v27 = vmul.f32 %v1171_v5, %v1152_v24  ;;  %v1208_v28 = vpop.permute.xlu0 %1207  ;;  %v1250_v45 = vmul.f32 %v1249_v37, %v1240_v29  ;;  %v1203_v46 = vadd.f32 %v1199_v1, %v1175_v30  ;;  %vm1245_vm4 = vcmp.ge.f32.partialorder %v1240_v29, 0.0  ;;  %v2654_v1 = vld [vmem:[%s4007_s6 + $0x38] sm:$0xff] }
 0xb52   : > { %v1217_v31 = vsel %vm1213_vm2, %v1208_v28, 0.0 }
 0xb53   : > { %v1237_v38 = vmul.f32 %v1226_v6, %v1217_v31  ;;  %v1212_v39 = vpop.permute.xlu1 %1211  ;;  %v1204_v40 = vadd.f32 %v1200_v32, %v1176_v27  ;;  %v1254_v55 = vsel %vm1245_vm4, %v1240_v29, %v1250_v45  ;;  %v2648_v31 = vld [vmem:[%s4006_s5 + $0x28] sm:$0xff]  ;;  %v2647_v32 = vld [vmem:[%s4006_s5 + $0x20] sm:$0xff] }
 0xb54   : > { %v1219_v2 = vsel %vm1213_vm2, %v1212_v39, 0.0  ;;  %v2649_v39 = vld [vmem:[%s4006_s5 + $0x30] sm:$0xff] }
 0xb55   : > { %v1241_v41 = vadd.f32 %v1237_v38, %v1202_v35  ;;  %v1239_v42 = vmul.f32 %v1234_v8, %v1219_v2  ;;  %v1210_v43 = vpop.permute.xlu0 %1209 }
 0xb56   : > { %v1218_v47 = vsel %vm1213_vm2, %v1210_v43, 0.0  ;;  %v2655_v43 = vld [vmem:[%s4008_s7 + $0x10] sm:$0xff] }
 0xb57   : > { %vm1246_vm3 = vcmp.ge.f32.partialorder %v1241_v41, 0.0  ;;  %v1251_v48 = vmul.f32 %v1249_v37, %v1241_v41  ;;  %v1243_v49 = vadd.f32 %v1239_v42, %v1204_v40  ;;  %v1238_v50 = vmul.f32 %v1230_v9, %v1218_v47  ;;  %v2650_v40 = vld [vmem:[%s4006_s5 + $0x38] sm:$0xff]  ;;  %v2653_v42 = vld [vmem:[%s4007_s6 + $0x30] sm:$0xff]  ;;  %2821 = vmatprep.mubr.msk.f32.mxu1 %vm831_vm11, %v2655_v43 }
 0xb59   : > { %v1242_v51 = vadd.f32 %v1238_v50, %v1203_v46  ;;  %v1255_v52 = vsel %vm1246_vm3, %v1241_v41, %v1251_v48  ;;  %v1253_v54 = vmul.f32 %v1249_v37, %v1243_v49  ;;  %vm1248_vm6 = vcmp.ge.f32.partialorder %v1243_v49, 0.0 }
 0xb5a   : > { %v1268_v56 = vadd.f32 %v1255_v52, %v1254_v55 }
 0xb5b   : > { %v1252_v53 = vmul.f32 %v1249_v37, %v1242_v51  ;;  %vm1247_vm5 = vcmp.ge.f32.partialorder %v1242_v51, 0.0  ;;  %v1257_v59 = vsel %vm1248_vm6, %v1243_v49, %v1253_v54 }
 0xb5d   : > { %v1256_v57 = vsel %vm1247_vm5, %v1242_v51, %v1252_v53 }
 0xb5e   : > { %v1269_v58 = vadd.f32 %v1268_v56, %v1256_v57 }
 0xb60   : > { %v1270_v61 = vadd.f32 %v1269_v58, %v1257_v59 }
 0xb62   : > { %1271 = vadd.xlane.f32.xlu0 %v1270_v61 }
 0xbef   : > { %v1272_v62 = vpop.xlane.xlu0 %1271 }
 0xbf0   : > { %v1273_v63 = vrot.slane %v1272_v62, 4 }
 0xbf2   : > { %v1274_v3 = vadd.f32 %v1273_v63, %v1272_v62 }
 0xbf4   : > { %v1275_v4 = vrot.slane %v1274_v3, 2 }
 0xbf6   : > { %v1276_v5 = vadd.f32 %v1275_v4, %v1274_v3  ;;  %v2656_v3 = vld [vmem:[%s4008_s7 + $0x18] sm:$0xff]  ;;  %v2659_v4 = vld [vmem:[%s4002_s1 + $0x40] sm:$0xff] }
 0xbf7   : > { %2828 = vmatprep.mubr.msk.f32.mxu0 %vm393_vm0, %v2659_v4  ;;  %v2670_v4 = vld [vmem:[%s4003_s2 + $0x50] sm:$0xff] }
 0xbf8   : > { %v1277_v6 = vrot.slane %v1276_v5, 1 }
 0xbfa   : > { %v1278_v7 = vadd.f32 %v1277_v6, %v1276_v5 }
 0xbfc   : > { %2932 = vpush %v1278_v7 }
 0xc2d   : > { %s2933_s11 = spop %2932 }
 0xc2e   : > { %s1280_s12 = smul.f32 0.00024414063, %s2933_s11  ;;  %s3204_s11 = smov 124  }
 0xc30   : > { %v1281_v9 = vstv %s1280_s12  ;;  %s2667_s12 = sld [smem:[#allocation2 + $0x2]] }
 0xc31   : > { %v1282_v8 = vsub.f32 %v1254_v55, %v1281_v9  ;;  %v1283_v10 = vsub.f32 %v1255_v52, %v1281_v9  ;;  %v3612_v11 = vsub.f32 %v1256_v57, %v1281_v9  ;;  %v1285_v12 = vsub.f32 %v1257_v59, %v1281_v9 }
 0xc33   : > { %v1286_v13 = vmul.f32 %v1282_v8, %v1282_v8  ;;  %v1287_v14 = vmul.f32 %v1283_v10, %v1283_v10  ;;  %v1288_v15 = vmul.f32 %v3612_v11, %v3612_v11  ;;  %v1289_v17 = vmul.f32 %v1285_v12, %v1285_v12 }
 0xc35   : > { %v1290_v16 = vadd.f32 %v1287_v14, %v1286_v13 }
 0xc37   : > { %v1291_v18 = vadd.f32 %v1290_v16, %v1288_v15 }
 0xc39   : > { %v1292_v19 = vadd.f32 %v1291_v18, %v1289_v17 }
 0xc3b   : > { %1293 = vadd.xlane.f32.xlu1 %v1292_v19 }
 0xc4c   : > { %1338 = vperm.xlu1 %3055, %v2651_v20  }
 0xc50   : > { %1343 = vperm.xlu1 %3055, %v2652_v21  }
 0xcc8   : > { %v1294_v22 = vpop.xlane.xlu1 %1293 }
 0xcc9   : > { %v1295_v23 = vrot.slane %v1294_v22, 4 }
 0xccb   : > { %v1296_v25 = vadd.f32 %v1295_v23, %v1294_v22 }
 0xccc   : > { %v1339_v45 = vpop.permute.xlu1 %1338 }
 0xccd   : > { %v1297_v24 = vrot.slane %v1296_v25, 2 }
 0xccf   : > { %v1298_v26 = vadd.f32 %v1297_v24, %v1296_v25 }
 0xcd0   : > { %v1344_v46 = vpop.permute.xlu1 %1343 }
 0xcd1   : > { %v1299_v27 = vrot.slane %v1298_v26, 1 }
 0xcd3   : > { %v1300_v28 = vadd.f32 %v1299_v27, %v1298_v26  ;;  %v2673_v27 = vld [vmem:[%s4004_s3 + $0x48] sm:$0xff] }
 0xcd5   : > { %2934 = vpush %v1300_v28 }
 0xd06   : > { %s2935_s27 = spop %2934 }
 0xd07   : > { %s1302_s28 = smul.f32 0.00024414063, %s2935_s27 }
 0xd09   : > { %s1303_s25 = sadd.f32 1e-08, %s1302_s28 }
 0xd0b   : > { %v1304_v29 = vstv %s1303_s25 }
 0xd0c   : > { %3082 = vrsqrt.f32 %v1304_v29 }
 0xd16   : > { %v3083_v30 = vpop.eup %3082 }
 0xd17   : > { %2936 = vpush %v3083_v30 }
 0xd48   : > { %s2937_s18 = spop %2936 }
 0xd49   : > { %v1307_v35 = vstv %s2937_s18 }
 0xd4a   : > { %v1309_v37 = vmul.f32 %v2648_v31, %v1307_v35  ;;  %v1308_v38 = vmul.f32 %v2647_v32, %v1307_v35  ;;  %v1310_v2 = vmul.f32 %v2649_v39, %v1307_v35  ;;  %v1311_v41 = vmul.f32 %v2650_v40, %v1307_v35 }
 0xd4c   : > { %1319 = vperm.xlu1 %3055, %v1309_v37   ;;  %1314 = vperm.xlu0 %3053, %v1308_v38  }
 0xd50   : > { %1324 = vperm.xlu1 %3055, %v1310_v2   ;;  %1353 = vperm.xlu0 %3053, %v2654_v1  }
 0xd54   : > { %1329 = vperm.xlu1 %3055, %v1311_v41  }
 0xd58   : > { %1348 = vperm.xlu1 %3055, %v2653_v42  }
 0xdcb   : > { %v1315_v47 = vpop.permute.xlu0 %1314  ;;  %v1320_v48 = vpop.permute.xlu1 %1319 }
 0xdcc   : > { %v1332_v49 = vmul.f32 %v1315_v47, %v1282_v8  ;;  %v1333_v50 = vmul.f32 %v1320_v48, %v1283_v10  ;;  %v2660_v10 = vld [vmem:[%s4002_s1 + $0x48] sm:$0xff] }
 0xdce   : > { %v1356_v51 = vadd.f32 %v1339_v45, %v1332_v49  ;;  %v1357_v52 = vadd.f32 %v1344_v46, %v1333_v50  ;;  %v2672_v49 = vld [vmem:[%s4004_s3 + $0x40] sm:$0xff] }
 0xdcf   : > { %v1325_v53 = vpop.permute.xlu1 %1324  ;;  %v1354_v58 = vpop.permute.xlu0 %1353 }
 0xdd0   : > { %v2882_v54 = vpack.c.bf16 %v1357_v52, %v1356_v51  ;;  %v1334_v57 = vmul.f32 %v1325_v53, %v3612_v11  ;;  %v2661_v11 = vld [vmem:[%s4002_s1 + $0x50] sm:$0xff] }
 0xdd2   : > { %2883 = vmatprep.subr.bf16.mxu1 %v2882_v54 }
 0xdd3   : > { %2885 = vmatpush3.bf16.msra.mxu1 %v2882_v54  ;;  %v1330_v55 = vpop.permute.xlu1 %1329 }
 0xdd4   : > { %v1335_v56 = vmul.f32 %v1330_v55, %v1285_v12 }
 0xdd6   : > { %v1359_v61 = vadd.f32 %v1354_v58, %v1335_v56 }
 0xdd7   : > { %v1349_v59 = vpop.permute.xlu1 %1348 }
 0xdd8   : > { %v1358_v62 = vadd.f32 %v1349_v59, %v1334_v57  ;;  %v2669_v59 = vld [vmem:[%s4003_s2 + $0x48] sm:$0xff] }
 0xdda   : > { %v2886_v63 = vpack.c.bf16 %v1359_v61, %v1358_v62  ;;  %v2668_v61 = vld [vmem:[%s4003_s2 + $0x40] sm:$0xff] }
 0xddc   : > { %2887 = vmatprep.subr.bf16.mxu1 %v2886_v63 }
 0xddd   : > { %2889 = vmatpush3.bf16.msra.mxu1 %v2886_v63 }
 0xde0   : > { %2822 = vmatmul.mubr.msk.f32.vlgmr.msra.gmra.mrb[2].mxu1 %vm831_vm11, %v2656_v3 }
 0xeb3   : > { %v2823_v5 = vpop.f32.mrb[2].mxu1 }
 0xeb4   : > { %v3654_v6 = vadd.f32 %v2823_v5, %v3509_v33  ;;  %v1435_v7 = vpop.f32.mrb[3].mxu1  ;;  %v2662_v33 = vld [vmem:[%s4002_s1 + $0x58] sm:$0xff] }
 0xeb5   : > { %v3657_v9 = vadd.f32 %v1435_v7, %v3512_v36  ;;  %v1553_v36 = vstv %s2667_s12  ;;  %v2671_v5 = vld [vmem:[%s4003_s2 + $0x58] sm:$0xff]  ;;  %s2680_s12 = sld [smem:[#allocation5 + $0x2]] }
 0xeb7   : > { %v2890_v8 = vpack.c.bf16 %v3654_v6, %v3657_v9 }
 0xeb9   : > { %2891 = vmatprep.subr.bf16.mxu0 %v2890_v8 }
 0xeba   : > { %2893 = vmatpush3.bf16.msra.mxu0 %v2890_v8 }
 0xebd   : > { %2829 = vmatmul.mubr.msk.f32.vlgmr.msra.gmra.mrb[8].mxu0 %vm393_vm0, %v2660_v10  ;;  %v2674_v10 = vld [vmem:[%s4004_s3 + $0x50] sm:$0xff] }
 0xebe   : > { %2831 = vmatprep.mubr.msk.f32.mxu0 %vm393_vm0, %v2661_v11  ;;  %v2675_v11 = vld [vmem:[%s4004_s3 + $0x58] sm:$0xff] }
 0xec1   : > { %2832 = vmatmul.mubr.msk.f32.gmra.mrb[10].mxu0 %vm393_vm0, %v2662_v33  ;;  %v2676_v33 = vld [vmem:[%s4005_s4 + $0x40] sm:$0xff] }
 0xf90   : > { %v2830_v12 = vpop.f32.mrb[8].mxu0 }
 0xf91   : > { %vm1550_vm7 = vcmp.ge.f32.partialorder %v2830_v12, 0.0  ;;  %v1555_v13 = vmul.f32 %v2830_v12, %v1553_v36  ;;  %v1529_v14 = vpop.f32.mrb[9].mxu0 }
 0xf92   : > { %vm1549_vm8 = vcmp.ge.f32.partialorder %v1529_v14, 0.0  ;;  %v1554_v15 = vmul.f32 %v1553_v36, %v1529_v14 }
 0xf93   : > { %v1559_v16 = vsel %vm1550_vm7, %v2830_v12, %v1555_v13  ;;  %v2678_v12 = vld [vmem:[%s4005_s4 + $0x50] sm:$0xff]  ;;  %v2679_v13 = vld [vmem:[%s4005_s4 + $0x58] sm:$0xff]  ;;  %vm2275_vm7 = vcmp.lt.s32.totalorder %v3442_v34, 120 }
 0xf94   : > { %v1558_v17 = vsel %vm1549_vm8, %v1529_v14, %v1554_v15  ;;  %v2833_v18 = vpop.f32.mrb[10].mxu0 }
 0xf95   : > { %v1539_v19 = vpop.f32.mrb[11].mxu0  ;;  %v1557_v20 = vmul.f32 %v2833_v18, %v1553_v36  ;;  %v1572_v22 = vadd.f32 %v1559_v16, %v1558_v17  ;;  %vm1552_vm10 = vcmp.ge.f32.partialorder %v2833_v18, 0.0 }
 0xf96   : > { %vm1551_vm9 = vcmp.ge.f32.partialorder %v1539_v19, 0.0  ;;  %v1556_v21 = vmul.f32 %v1553_v36, %v1539_v19  ;;  %v2677_v36 = vld [vmem:[%s4005_s4 + $0x48] sm:$0xff] }
 0xf97   : > { %v1561_v24 = vsel %vm1552_vm10, %v2833_v18, %v1557_v20 }
 0xf98   : > { %v1560_v23 = vsel %vm1551_vm9, %v1539_v19, %v1556_v21 }
 0xf99   : > { %v1573_v25 = vadd.f32 %v1572_v22, %v1560_v23 }
 0xf9b   : > { %v1574_v26 = vadd.f32 %v1573_v25, %v1561_v24 }
 0xf9d   : > { %1575 = vadd.xlane.f32.xlu1 %v1574_v26 }
 0xfae   : > { %1647 = vperm.xlu1 %3055, %v2673_v27  }
0x102a   : > { %v1576_v28 = vpop.xlane.xlu1 %1575 }
0x102b   : > { %v1577_v29 = vrot.slane %v1576_v28, 4 }
0x102d   : > { %v1578_v30 = vadd.f32 %v1577_v29, %v1576_v28 }
0x102e   : > { %v1648_v14 = vpop.permute.xlu1 %1647 }
0x102f   : > { %v1579_v31 = vrot.slane %v1578_v30, 2 }
0x1031   : > { %v1580_v32 = vadd.f32 %v1579_v31, %v1578_v30 }
0x1033   : > { %v1581_v35 = vrot.slane %v1580_v32, 1 }
0x1035   : > { %v1582_v37 = vadd.f32 %v1581_v35, %v1580_v32 }
0x1037   : > { %2938 = vpush %v1582_v37 }
0x1068   : > { %s2939_s21 = spop %2938 }
0x1069   : > { %s1584_s26 = smul.f32 0.00024414063, %s2939_s21 }
0x106b   : > { %v1585_v38 = vstv %s1584_s26 }
0x106c   : > { %v3676_v39 = vsub.f32 %v1558_v17, %v1585_v38  ;;  %v3678_v1 = vsub.f32 %v1559_v16, %v1585_v38  ;;  %v3680_v2 = vsub.f32 %v1560_v23, %v1585_v38  ;;  %v3682_v40 = vsub.f32 %v1561_v24, %v1585_v38 }
0x106e   : > { %v1590_v41 = vmul.f32 %v3676_v39, %v3676_v39  ;;  %v1591_v42 = vmul.f32 %v3678_v1, %v3678_v1  ;;  %v1592_v43 = vmul.f32 %v3680_v2, %v3680_v2  ;;  %v1593_v46 = vmul.f32 %v3682_v40, %v3682_v40 }
0x1070   : > { %v1594_v45 = vadd.f32 %v1591_v42, %v1590_v41 }
0x1072   : > { %v1595_v47 = vadd.f32 %v1594_v45, %v1592_v43 }
0x1074   : > { %v1596_v48 = vadd.f32 %v1595_v47, %v1593_v46 }
0x1076   : > { %1597 = vadd.xlane.f32.xlu0 %v1596_v48 }
0x108c   : > { %1642 = vperm.xlu0 %3053, %v2672_v49  }
0x1103   : > { %v1598_v50 = vpop.xlane.xlu0 %1597 }
0x1104   : > { %v1599_v51 = vrot.slane %v1598_v50, 4 }
0x1106   : > { %v1600_v52 = vadd.f32 %v1599_v51, %v1598_v50 }
0x1108   : > { %v1601_v53 = vrot.slane %v1600_v52, 2 }
0x110a   : > { %v1602_v54 = vadd.f32 %v1601_v53, %v1600_v52 }
0x110b   : > { %v1643_v15 = vpop.permute.xlu0 %1642 }
0x110c   : > { %v1603_v55 = vrot.slane %v1602_v54, 1 }
0x110e   : > { %v1604_v56 = vadd.f32 %v1603_v55, %v1602_v54 }
0x1110   : > { %2940 = vpush %v1604_v56 }
0x1141   : > { %s2941_s25 = spop %2940 }
0x1142   : > { %s1606_s29 = smul.f32 0.00024414063, %s2941_s25 }
0x1144   : > { %s1607_s30 = sadd.f32 1e-08, %s1606_s29  ;;  %s3207_s29 = smov [#allocation7]  }
0x1146   : > { %v1608_v57 = vstv %s1607_s30  ;;  %s3203_s30 = smov 4  }
0x1147   : > { %3084 = vrsqrt.f32 %v1608_v57 }
0x1151   : > { %v3085_v58 = vpop.eup %3084 }
0x1152   : > { %2942 = vpush %v3085_v58 }
0x1183   : > { %s2943_s21 = spop %2942 }
0x1184   : > { %v1611_v62 = vstv %s2943_s21 }
0x1185   : > { %v1613_v63 = vmul.f32 %v2669_v59, %v1611_v62  ;;  %v1612_v3 = vmul.f32 %v2668_v61, %v1611_v62  ;;  %v1614_v7 = vmul.f32 %v2670_v4, %v1611_v62  ;;  %v1615_v8 = vmul.f32 %v2671_v5, %v1611_v62 }
0x1187   : > { %1623 = vperm.xlu1 %3055, %v1613_v63   ;;  %1618 = vperm.xlu0 %3053, %v1612_v3  }
0x118b   : > { %1628 = vperm.xlu1 %3055, %v1614_v7   ;;  %1633 = vperm.xlu0 %3053, %v1615_v8   ;;  %v1780_v8 = vstv %s2680_s12 }
0x118f   : > { %1652 = vperm.xlu1 %3055, %v2674_v10   ;;  %1657 = vperm.xlu0 %3053, %v2675_v11  }
0x1193   : > { %1686 = vperm.xlu1 %3055, %v2676_v33   ;;  %3059 = vset.pattern.permute.xlu0 %v3197_v60 }
0x1194   : > { %1752 = vperm.xlu0 %3059, %v2676_v33  }
0x1197   : > { %3056 = vset.pattern.permute.xlu1 %v3198_v0 }
0x1198   : > { %1713 = vperm.xlu1 %3056, %v2676_v33   ;;  %3060 = vset.pattern.permute.xlu0 %v3198_v0 }
0x1199   : > { %1717 = vperm.xlu0 %3060, %v2677_v36  }
0x119c   : > { %3057 = vset.pattern.permute.xlu1 %v3196_v44 }
0x119d   : > { %1696 = vperm.xlu1 %3057, %v2678_v12   ;;  %1725 = vperm.xlu0 %3060, %v2679_v13  }
0x11a1   : > { %3058 = vset.pattern.permute.xlu1 %v3198_v0  ;;  %3063 = vset.pattern.permute.xlu0 %v3196_v44 }
0x11a2   : > { %1721 = vperm.xlu1 %3058, %v2678_v12   ;;  %1691 = vperm.xlu0 %3063, %v2677_v36  }
0x11a6   : > { %3061 = vset.pattern.permute.xlu1 %v3197_v60 }
0x11a7   : > { %1756 = vperm.xlu1 %3061, %v2677_v36  }
0x11ab   : > { %3062 = vset.pattern.permute.xlu1 %v3196_v44 }
0x11ac   : > { %1701 = vperm.xlu1 %3062, %v2679_v13  }
0x11b0   : > { %3064 = vset.pattern.permute.xlu1 %v3197_v60 }
0x11b1   : > { %1760 = vperm.xlu1 %3064, %v2678_v12  }
0x11b5   : > { %1764 = vperm.xlu1 %3064, %v2679_v13  }
0x11b9   : > { %3065 = vset.pattern.permute.xlu1 %v3196_v44 }
0x1206   : > { %v1619_v16 = vpop.permute.xlu0 %1618  ;;  %v1624_v17 = vpop.permute.xlu1 %1623 }
0x1207   : > { %v1636_v18 = vmul.f32 %v1619_v16, %v3676_v39  ;;  %v1637_v19 = vmul.f32 %v1624_v17, %v3678_v1 }
0x1209   : > { %v1660_v20 = vadd.f32 %v1643_v15, %v1636_v18  ;;  %v1661_v21 = vadd.f32 %v1648_v14, %v1637_v19 }
0x120a   : > { %v1634_v22 = vpop.permute.xlu0 %1633  ;;  %v1629_v23 = vpop.permute.xlu1 %1628 }
0x120b   : > { %1669 = vrot.lane.b32.xlu1 %v1660_v20, %s3203_s30  ;;  %1671 = vrot.lane.b32.xlu0 %v1661_v21, %s3203_s30  ;;  %v1638_v25 = vmul.f32 %v1629_v23, %v3680_v2  ;;  %v1639_v27 = vmul.f32 %v1634_v22, %v3682_v40 }
0x120e   : > { %v1658_v24 = vpop.permute.xlu0 %1657  ;;  %v1653_v26 = vpop.permute.xlu1 %1652 }
0x120f   : > { %v1662_v28 = vadd.f32 %v1653_v26, %v1638_v25  ;;  %1736 = vrot.lane.b32.xlu1 %v1660_v20, %s3204_s11  ;;  %v1663_v29 = vadd.f32 %v1658_v24, %v1639_v27 }
0x1211   : > { %1673 = vrot.lane.b32.xlu0 %v1662_v28, %s3203_s30 }
0x1212   : > { %v1687_v30 = vpop.permute.xlu1 %1686 }
0x1213   : > { %1675 = vrot.lane.b32.xlu1 %v1663_v29, %s3203_s30  ;;  %v1753_v38 = vpop.permute.xlu0 %1752 }
0x1215   : > { %1738 = vrot.lane.b32.xlu0 %v1661_v21, %s3204_s11 }
0x1217   : > { %1742 = vrot.lane.b32.xlu1 %v1663_v29, %s3204_s11  ;;  %v1714_v31 = vpop.permute.xlu1 %1713 }
0x1218   : > { %v1718_v1 = vpop.permute.xlu0 %1717  ;;  %v1728_v52 = vmul.f32 %v1714_v31, %v1660_v20 }
0x1219   : > { %1740 = vrot.lane.b32.xlu0 %v1662_v28, %s3204_s11  ;;  %v1729_v59 = vmul.f32 %v1718_v1, %v1661_v21 }
0x121c   : > { %v1697_v32 = vpop.permute.xlu1 %1696  ;;  %v1726_v41 = vpop.permute.xlu0 %1725 }
0x121d   : > { %v1731_v5 = vmul.f32 %v1726_v41, %v1663_v29 }
0x1221   : > { %v1722_v35 = vpop.permute.xlu1 %1721  ;;  %v1692_v42 = vpop.permute.xlu0 %1691 }
0x1222   : > { %v1730_v33 = vmul.f32 %v1722_v35, %v1662_v28 }
0x1226   : > { %v1757_v37 = vpop.permute.xlu1 %1756 }
0x122b   : > { %v1702_v39 = vpop.permute.xlu1 %1701 }
0x1230   : > { %v1761_v2 = vpop.permute.xlu1 %1760 }
0x1234   : > { %v1765_v40 = vpop.permute.xlu1 %1764 }
0x127d   : > { %v1670_v43 = vpop.permute.xlu1 %1669  ;;  %v1672_v45 = vpop.permute.xlu0 %1671 }
0x127e   : > { %v1680_v46 = vsel %vm1677_vm12, %v1670_v43, 0.0  ;;  %v1681_v48 = vsel %vm1677_vm12, %v1672_v45, 0.0 }
0x127f   : > { %v1704_v49 = vmul.f32 %v1687_v30, %v1680_v46  ;;  %v1705_v54 = vmul.f32 %v1692_v42, %v1681_v48 }
0x1281   : > { %v1737_v47 = vpop.permute.xlu1 %1736  ;;  %v1732_v57 = vadd.f32 %v1728_v52, %v1704_v49  ;;  %v1733_v7 = vadd.f32 %v1729_v59, %v1705_v54  ;;  %v2686_v54 = vld [vmem:[%s4007_s6 + $0x48] sm:$0xff] }
0x1282   : > { %v1747_v50 = vsel %vm1744_vm13, %v1737_v47, 0.0 }
0x1283   : > { %v1674_v51 = vpop.permute.xlu0 %1673  ;;  %v1767_v53 = vmul.f32 %v1753_v38, %v1747_v50 }
0x1284   : > { %v1682_v55 = vsel %vm1677_vm12, %v1674_v51, 0.0 }
0x1285   : > { %v1676_v56 = vpop.permute.xlu1 %1675  ;;  %v1771_v63 = vadd.f32 %v1767_v53, %v1732_v57  ;;  %v1706_v3 = vmul.f32 %v1697_v32, %v1682_v55  ;;  %v2685_v53 = vld [vmem:[%s4007_s6 + $0x40] sm:$0xff]  ;;  %v2687_v55 = vld [vmem:[%s4007_s6 + $0x50] sm:$0xff] }
0x1286   : > { %v1683_v58 = vsel %vm1677_vm12, %v1676_v56, 0.0 }
0x1287   : > { %v1707_v61 = vmul.f32 %v1702_v39, %v1683_v58  ;;  %v1739_v62 = vpop.permute.xlu0 %1738  ;;  %v1781_v16 = vmul.f32 %v1780_v8, %v1771_v63  ;;  %v1734_v17 = vadd.f32 %v1730_v33, %v1706_v3  ;;  %vm1776_vm15 = vcmp.ge.f32.partialorder %v1771_v63, 0.0  ;;  %v2683_v33 = vld [vmem:[%s4006_s5 + $0x50] sm:$0xff] }
0x1288   : > { %v1748_v4 = vsel %vm1744_vm13, %v1739_v62, 0.0 }
0x1289   : > { %v1768_v10 = vmul.f32 %v1757_v37, %v1748_v4  ;;  %v1743_v11 = vpop.permute.xlu1 %1742  ;;  %v1735_v12 = vadd.f32 %v1731_v5, %v1707_v61  ;;  %v1785_v26 = vsel %vm1776_vm15, %v1771_v63, %v1781_v16  ;;  %v2682_v5 = vld [vmem:[%s4006_s5 + $0x48] sm:$0xff] }
0x128a   : > { %v1750_v36 = vsel %vm1744_vm13, %v1743_v11, 0.0 }
0x128b   : > { %v1772_v13 = vadd.f32 %v1768_v10, %v1733_v7  ;;  %v1770_v14 = vmul.f32 %v1765_v40, %v1750_v36  ;;  %v1741_v15 = vpop.permute.xlu0 %1740  ;;  %v2681_v7 = vld [vmem:[%s4006_s5 + $0x40] sm:$0xff] }
0x128c   : > { %v1749_v18 = vsel %vm1744_vm13, %v1741_v15, 0.0  ;;  %v2689_v15 = vld [vmem:[%s4008_s7 + $0x20] sm:$0xff] }
0x128d   : > { %vm1777_vm14 = vcmp.ge.f32.partialorder %v1772_v13, 0.0  ;;  %v1782_v19 = vmul.f32 %v1780_v8, %v1772_v13  ;;  %v1774_v20 = vadd.f32 %v1770_v14, %v1735_v12  ;;  %v1769_v21 = vmul.f32 %v1761_v2, %v1749_v18  ;;  %v2684_v12 = vld [vmem:[%s4006_s5 + $0x58] sm:$0xff]  ;;  %2842 = vmatprep.mubr.msk.f32.mxu1 %vm831_vm11, %v2689_v15 }
0x128e   : > { %v2688_v14 = vld [vmem:[%s4007_s6 + $0x58] sm:$0xff] }
0x128f   : > { %v1773_v22 = vadd.f32 %v1769_v21, %v1734_v17  ;;  %v1786_v23 = vsel %vm1777_vm14, %v1772_v13, %v1782_v19  ;;  %v1784_v24 = vmul.f32 %v1780_v8, %v1774_v20  ;;  %vm1779_vm2 = vcmp.ge.f32.partialorder %v1774_v20, 0.0 }
0x1290   : > { %v1799_v27 = vadd.f32 %v1786_v23, %v1785_v26 }
0x1291   : > { %v1783_v25 = vmul.f32 %v1780_v8, %v1773_v22  ;;  %vm1778_vm1 = vcmp.ge.f32.partialorder %v1773_v22, 0.0  ;;  %v1788_v30 = vsel %vm1779_vm2, %v1774_v20, %v1784_v24 }
0x1293   : > { %v1787_v28 = vsel %vm1778_vm1, %v1773_v22, %v1783_v25 }
0x1294   : > { %v1800_v29 = vadd.f32 %v1799_v27, %v1787_v28 }
0x1296   : > { %v1801_v31 = vadd.f32 %v1800_v29, %v1788_v30 }
0x1298   : > { %1802 = vadd.xlane.f32.xlu0 %v1801_v31 }
0x1325   : > { %v1803_v32 = vpop.xlane.xlu0 %1802 }
0x1326   : > { %v1804_v35 = vrot.slane %v1803_v32, 4 }
0x1328   : > { %v1805_v37 = vadd.f32 %v1804_v35, %v1803_v32 }
0x132a   : > { %v1806_v38 = vrot.slane %v1805_v37, 2 }
0x132c   : > { %v1807_v39 = vadd.f32 %v1806_v38, %v1805_v37  ;;  %v2690_v37 = vld [vmem:[%s4008_s7 + $0x28] sm:$0xff]  ;;  %v2693_v38 = vld [vmem:[%s4002_s1 + $0x60] sm:$0xff] }
0x132d   : > { %2849 = vmatprep.mubr.msk.f32.mxu0 %vm393_vm0, %v2693_v38  ;;  %v2705_v38 = vld [vmem:[%s4003_s2 + $0x78] sm:$0xff] }
0x132e   : > { %v1808_v1 = vrot.slane %v1807_v39, 1 }
0x1330   : > { %v1809_v2 = vadd.f32 %v1808_v1, %v1807_v39 }
0x1332   : > { %2944 = vpush %v1809_v2 }
0x1363   : > { %s2945_s18 = spop %2944 }
0x1364   : > { %s1811_s20 = smul.f32 0.00024414063, %s2945_s18  ;;  %s3206_s18 = smov 120  }
0x1366   : > { %v1812_v41 = vstv %s1811_s20  ;;  %s2701_s20 = sld [smem:[#allocation2 + $0x3]] }
0x1367   : > { %v1813_v40 = vsub.f32 %v1785_v26, %v1812_v41  ;;  %v1814_v42 = vsub.f32 %v1786_v23, %v1812_v41  ;;  %v3757_v43 = vsub.f32 %v1787_v28, %v1812_v41  ;;  %v3759_v45 = vsub.f32 %v1788_v30, %v1812_v41 }
0x1369   : > { %v1817_v46 = vmul.f32 %v1813_v40, %v1813_v40  ;;  %v1818_v47 = vmul.f32 %v1814_v42, %v1814_v42  ;;  %v1819_v48 = vmul.f32 %v3757_v43, %v3757_v43  ;;  %v1820_v50 = vmul.f32 %v3759_v45, %v3759_v45 }
0x136b   : > { %v1821_v49 = vadd.f32 %v1818_v47, %v1817_v46 }
0x136d   : > { %v1822_v51 = vadd.f32 %v1821_v49, %v1819_v48 }
0x136f   : > { %v1823_v52 = vadd.f32 %v1822_v51, %v1820_v50 }
0x1371   : > { %1824 = vadd.xlane.f32.xlu1 %v1823_v52 }
0x1382   : > { %1869 = vperm.xlu1 %3065, %v2685_v53  }
0x1386   : > { %1874 = vperm.xlu1 %3065, %v2686_v54  }
0x138a   : > { %1879 = vperm.xlu1 %3065, %v2687_v55  }
0x13fe   : > { %v1825_v56 = vpop.xlane.xlu1 %1824 }
0x13ff   : > { %v1826_v57 = vrot.slane %v1825_v56, 4 }
0x1401   : > { %v1827_v58 = vadd.f32 %v1826_v57, %v1825_v56 }
0x1402   : > { %v1870_v16 = vpop.permute.xlu1 %1869 }
0x1403   : > { %v1828_v59 = vrot.slane %v1827_v58, 2 }
0x1405   : > { %v1829_v61 = vadd.f32 %v1828_v59, %v1827_v58 }
0x1406   : > { %v1875_v17 = vpop.permute.xlu1 %1874 }
0x1407   : > { %v1830_v62 = vrot.slane %v1829_v61, 1 }
0x1409   : > { %v1831_v63 = vadd.f32 %v1830_v62, %v1829_v61  ;;  %v2707_v61 = vld [vmem:[%s4004_s3 + $0x68] sm:$0xff] }
0x140a   : > { %v1880_v18 = vpop.permute.xlu1 %1879 }
0x140b   : > { %2946 = vpush %v1831_v63 }
0x143c   : > { %s2947_s30 = spop %2946 }
0x143d   : > { %s1833_s11 = smul.f32 0.00024414063, %s2947_s30 }
0x143f   : > { %s1834_s12 = sadd.f32 1e-08, %s1833_s11 }
0x1441   : > { %v1835_v3 = vstv %s1834_s12 }
0x1442   : > { %3086 = vrsqrt.f32 %v1835_v3 }
0x144c   : > { %v3087_v4 = vpop.eup %3086 }
0x144d   : > { %2948 = vpush %v3087_v4 }
0x147e   : > { %s2949_s27 = spop %2948 }
0x147f   : > { %v1838_v8 = vstv %s2949_s27 }
0x1480   : > { %v1840_v10 = vmul.f32 %v2682_v5, %v1838_v8  ;;  %v1839_v11 = vmul.f32 %v2681_v7, %v1838_v8  ;;  %v1841_v36 = vmul.f32 %v2683_v33, %v1838_v8  ;;  %v1842_v13 = vmul.f32 %v2684_v12, %v1838_v8 }
0x1482   : > { %1850 = vperm.xlu1 %3065, %v1840_v10   ;;  %1845 = vperm.xlu0 %3063, %v1839_v11  }
0x1486   : > { %1855 = vperm.xlu1 %3065, %v1841_v36  }
0x148a   : > { %1860 = vperm.xlu1 %3065, %v1842_v13  }
0x148e   : > { %1884 = vperm.xlu1 %3065, %v2688_v14  }
0x1501   : > { %v1846_v19 = vpop.permute.xlu0 %1845  ;;  %v1851_v20 = vpop.permute.xlu1 %1850 }
0x1502   : > { %v1863_v21 = vmul.f32 %v1846_v19, %v1813_v40  ;;  %v1864_v22 = vmul.f32 %v1851_v20, %v1814_v42  ;;  %v2694_v42 = vld [vmem:[%s4002_s1 + $0x68] sm:$0xff]  ;;  %v2706_v20 = vld [vmem:[%s4004_s3 + $0x60] sm:$0xff] }
0x1504   : > { %v1887_v23 = vadd.f32 %v1870_v16, %v1863_v21  ;;  %v1888_v25 = vadd.f32 %v1875_v17, %v1864_v22 }
0x1505   : > { %v1856_v24 = vpop.permute.xlu1 %1855 }
0x1506   : > { %v2894_v26 = vpack.c.bf16 %v1888_v25, %v1887_v23  ;;  %v1865_v28 = vmul.f32 %v1856_v24, %v3757_v43  ;;  %v2695_v43 = vld [vmem:[%s4002_s1 + $0x70] sm:$0xff] }
0x1508   : > { %2895 = vmatprep.subr.bf16.mxu1 %v2894_v26  ;;  %v1889_v31 = vadd.f32 %v1880_v18, %v1865_v28 }
0x1509   : > { %2897 = vmatpush3.bf16.msra.mxu1 %v2894_v26  ;;  %v1861_v27 = vpop.permute.xlu1 %1860 }
0x150a   : > { %v1866_v29 = vmul.f32 %v1861_v27, %v3759_v45 }
0x150d   : > { %v1885_v30 = vpop.permute.xlu1 %1884 }
0x150e   : > { %v1890_v32 = vadd.f32 %v1885_v30, %v1866_v29  ;;  %v2703_v30 = vld [vmem:[%s4003_s2 + $0x68] sm:$0xff] }
0x1510   : > { %v2898_v35 = vpack.c.bf16 %v1890_v32, %v1889_v31  ;;  %v2702_v31 = vld [vmem:[%s4003_s2 + $0x60] sm:$0xff] }
0x1512   : > { %2899 = vmatprep.subr.bf16.mxu1 %v2898_v35 }
0x1513   : > { %2901 = vmatpush3.bf16.msra.mxu1 %v2898_v35 }
0x1516   : > { %2843 = vmatmul.mubr.msk.f32.vlgmr.msra.gmra.mrb[4].mxu1 %vm831_vm11, %v2690_v37 }
0x15e9   : > { %v2844_v39 = vpop.f32.mrb[4].mxu1 }
0x15ea   : > { %v3804_v1 = vadd.f32 %v2844_v39, %v3654_v6  ;;  %v1966_v2 = vpop.f32.mrb[5].mxu1  ;;  %v2696_v6 = vld [vmem:[%s4002_s1 + $0x78] sm:$0xff]  ;;  %v2704_v39 = vld [vmem:[%s4003_s2 + $0x70] sm:$0xff] }
0x15eb   : > { %v3807_v41 = vadd.f32 %v1966_v2, %v3657_v9  ;;  %v2084_v9 = vstv %s2701_s20  ;;  %s2714_s20 = sld [smem:[#allocation5 + $0x3]] }
0x15ed   : > { %v2902_v40 = vpack.c.bf16 %v3804_v1, %v3807_v41 }
0x15ef   : > { %2903 = vmatprep.subr.bf16.mxu0 %v2902_v40 }
0x15f0   : > { %2905 = vmatpush3.bf16.msra.mxu0 %v2902_v40 }
0x15f3   : > { %2850 = vmatmul.mubr.msk.f32.vlgmr.msra.gmra.mrb[12].mxu0 %vm393_vm0, %v2694_v42  ;;  %v2709_v42 = vld [vmem:[%s4004_s3 + $0x78] sm:$0xff] }
0x15f4   : > { %2852 = vmatprep.mubr.msk.f32.mxu0 %vm393_vm0, %v2695_v43  ;;  %v2708_v43 = vld [vmem:[%s4004_s3 + $0x70] sm:$0xff] }
0x15f7   : > { %2853 = vmatmul.mubr.msk.f32.gmra.mrb[14].mxu0 %vm393_vm0, %v2696_v6  ;;  %v2711_v6 = vld [vmem:[%s4005_s4 + $0x68] sm:$0xff]  ;;  %vm2208_vm0 = vcmp.ge.s32.totalorder %v3442_v34, 8 }
0x16c6   : > { %v2851_v45 = vpop.f32.mrb[12].mxu0 }
0x16c7   : > { %vm2081_vm3 = vcmp.ge.f32.partialorder %v2851_v45, 0.0  ;;  %v2086_v46 = vmul.f32 %v2851_v45, %v2084_v9  ;;  %v2060_v47 = vpop.f32.mrb[13].mxu0 }
0x16c8   : > { %vm2080_vm4 = vcmp.ge.f32.partialorder %v2060_v47, 0.0  ;;  %v2085_v48 = vmul.f32 %v2084_v9, %v2060_v47 }
0x16c9   : > { %v2090_v49 = vsel %vm2081_vm3, %v2851_v45, %v2086_v46  ;;  %v2712_v45 = vld [vmem:[%s4005_s4 + $0x70] sm:$0xff]  ;;  %v2713_v46 = vld [vmem:[%s4005_s4 + $0x78] sm:$0xff] }
0x16ca   : > { %v2089_v50 = vsel %vm2080_vm4, %v2060_v47, %v2085_v48  ;;  %v2854_v51 = vpop.f32.mrb[14].mxu0 }
0x16cb   : > { %v2070_v52 = vpop.f32.mrb[15].mxu0  ;;  %v2088_v53 = vmul.f32 %v2854_v51, %v2084_v9  ;;  %v2103_v55 = vadd.f32 %v2090_v49, %v2089_v50  ;;  %vm2083_vm6 = vcmp.ge.f32.partialorder %v2854_v51, 0.0 }
0x16cc   : > { %vm2082_vm5 = vcmp.ge.f32.partialorder %v2070_v52, 0.0  ;;  %v2087_v54 = vmul.f32 %v2084_v9, %v2070_v52  ;;  %v2710_v9 = vld [vmem:[%s4005_s4 + $0x60] sm:$0xff] }
0x16cd   : > { %v2092_v58 = vsel %vm2083_vm6, %v2854_v51, %v2088_v53 }
0x16ce   : > { %v2091_v56 = vsel %vm2082_vm5, %v2070_v52, %v2087_v54 }
0x16cf   : > { %v2104_v57 = vadd.f32 %v2103_v55, %v2091_v56 }
0x16d1   : > { %v2105_v59 = vadd.f32 %v2104_v57, %v2092_v58 }
0x16d3   : > { %2106 = vadd.xlane.f32.xlu0 %v2105_v59 }
0x16e9   : > { %2178 = vperm.xlu0 %3063, %v2707_v61  }
0x1760   : > { %v2107_v62 = vpop.xlane.xlu0 %2106 }
0x1761   : > { %v2108_v63 = vrot.slane %v2107_v62, 4 }
0x1763   : > { %v2109_v3 = vadd.f32 %v2108_v63, %v2107_v62 }
0x1765   : > { %v2110_v4 = vrot.slane %v2109_v3, 2 }
0x1767   : > { %v2111_v5 = vadd.f32 %v2110_v4, %v2109_v3 }
0x1768   : > { %v2179_v47 = vpop.permute.xlu0 %2178 }
0x1769   : > { %v2112_v7 = vrot.slane %v2111_v5, 1 }
0x176b   : > { %v2113_v8 = vadd.f32 %v2112_v7, %v2111_v5 }
0x176d   : > { %2950 = vpush %v2113_v8 }
0x179e   : > { %s2951_s27 = spop %2950 }
0x179f   : > { %s2115_s28 = smul.f32 0.00024414063, %s2951_s27 }
0x17a1   : > { %v2116_v10 = vstv %s2115_s28 }
0x17a2   : > { %v3826_v11 = vsub.f32 %v2089_v50, %v2116_v10  ;;  %v3828_v33 = vsub.f32 %v2090_v49, %v2116_v10  ;;  %v3830_v36 = vsub.f32 %v2091_v56, %v2116_v10  ;;  %v3832_v12 = vsub.f32 %v2092_v58, %v2116_v10 }
0x17a4   : > { %v2121_v13 = vmul.f32 %v3826_v11, %v3826_v11  ;;  %v2122_v14 = vmul.f32 %v3828_v33, %v3828_v33  ;;  %v2123_v15 = vmul.f32 %v3830_v36, %v3830_v36  ;;  %v2124_v17 = vmul.f32 %v3832_v12, %v3832_v12 }
0x17a6   : > { %v2125_v16 = vadd.f32 %v2122_v14, %v2121_v13 }
0x17a8   : > { %v2126_v18 = vadd.f32 %v2125_v16, %v2123_v15 }
0x17aa   : > { %v2127_v19 = vadd.f32 %v2126_v18, %v2124_v17 }
0x17ac   : > { %2128 = vadd.xlane.f32.xlu1 %v2127_v19 }
0x17bd   : > { %2173 = vperm.xlu1 %3065, %v2706_v20  }
0x1839   : > { %v2129_v21 = vpop.xlane.xlu1 %2128 }
0x183a   : > { %v2130_v22 = vrot.slane %v2129_v21, 4 }
0x183c   : > { %v2131_v23 = vadd.f32 %v2130_v22, %v2129_v21 }
0x183d   : > { %v2174_v48 = vpop.permute.xlu1 %2173 }
0x183e   : > { %v2132_v25 = vrot.slane %v2131_v23, 2 }
0x1840   : > { %v2133_v24 = vadd.f32 %v2132_v25, %v2131_v23 }
0x1842   : > { %v2134_v26 = vrot.slane %v2133_v24, 1 }
0x1844   : > { %v2135_v27 = vadd.f32 %v2134_v26, %v2133_v24 }
0x1846   : > { %2952 = vpush %v2135_v27 }
0x1877   : > { %s2953_s30 = spop %2952 }
0x1878   : > { %s2137_s11 = smul.f32 0.00024414063, %s2953_s30 }
0x187a   : > { %s2138_s12 = sadd.f32 1e-08, %s2137_s11 }
0x187c   : > { %v2139_v28 = vstv %s2138_s12  ;;  %s4015_s12 = smov 8  }
0x187d   : > { %3088 = vrsqrt.f32 %v2139_v28 }
0x1887   : > { %v3089_v29 = vpop.eup %3088 }
0x1888   : > { %2954 = vpush %v3089_v29 }
0x18b9   : > { %s2955_s27 = spop %2954 }
0x18ba   : > { %v2142_v32 = vstv %s2955_s27 }
0x18bb   : > { %v2144_v35 = vmul.f32 %v2703_v30, %v2142_v32  ;;  %v2143_v37 = vmul.f32 %v2702_v31, %v2142_v32  ;;  %v2146_v2 = vmul.f32 %v2705_v38, %v2142_v32  ;;  %v2145_v40 = vmul.f32 %v2704_v39, %v2142_v32 }
0x18bc   : > { %v2311_v38 = vstv %s2714_s20 }
0x18bd   : > { %2154 = vperm.xlu1 %3065, %v2144_v35   ;;  %2149 = vperm.xlu0 %3063, %v2143_v37  }
0x18c1   : > { %2164 = vperm.xlu1 %3065, %v2146_v2   ;;  %2159 = vperm.xlu0 %3063, %v2145_v40  }
0x18c5   : > { %2188 = vperm.xlu1 %3065, %v2709_v42   ;;  %2183 = vperm.xlu0 %3063, %v2708_v43  }
0x18c9   : > { %2222 = vperm.xlu1 %3065, %v2711_v6   ;;  %3066 = vset.pattern.permute.xlu0 %v3198_v0 }
0x18ca   : > { %2244 = vperm.xlu0 %3066, %v2710_v9  }
0x18cd   : > { %3067 = vset.pattern.permute.xlu1 %v3198_v0 }
0x18ce   : > { %2248 = vperm.xlu1 %3067, %v2711_v6   ;;  %2252 = vperm.xlu0 %3066, %v2712_v45  }
0x18d2   : > { %3068 = vset.pattern.permute.xlu1 %v3196_v44  ;;  %3070 = vset.pattern.permute.xlu0 %v3197_v60 }
0x18d3   : > { %2227 = vperm.xlu1 %3068, %v2712_v45   ;;  %2287 = vperm.xlu0 %3070, %v2711_v6  }
0x18d7   : > { %3069 = vset.pattern.permute.xlu1 %v3197_v60  ;;  %2291 = vperm.xlu0 %3070, %v2712_v45  }
0x18d8   : > { %2283 = vperm.xlu1 %3069, %v2710_v9  }
0x18db   : > { %3073 = vset.pattern.permute.xlu0 %v3196_v44 }
0x18dc   : > { %3071 = vset.pattern.permute.xlu1 %v3196_v44  ;;  %2217 = vperm.xlu0 %3073, %v2710_v9  }
0x18dd   : > { %2232 = vperm.xlu1 %3071, %v2713_v46  }
0x18e1   : > { %3072 = vset.pattern.permute.xlu1 %v3198_v0 }
0x18e2   : > { %2256 = vperm.xlu1 %3072, %v2713_v46  }
0x18e6   : > { %3074 = vset.pattern.permute.xlu1 %v3197_v60 }
0x18e7   : > { %2295 = vperm.xlu1 %3074, %v2713_v46  }
0x18eb   : > { %3075 = vset.pattern.permute.xlu1 %v3196_v44 }
0x193c   : > { %v2155_v49 = vpop.permute.xlu1 %2154  ;;  %v2150_v50 = vpop.permute.xlu0 %2149 }
0x193d   : > { %v2168_v51 = vmul.f32 %v2155_v49, %v3828_v33  ;;  %v2167_v52 = vmul.f32 %v2150_v50, %v3826_v11 }
0x193f   : > { %v2192_v53 = vadd.f32 %v2179_v47, %v2168_v51  ;;  %v2191_v54 = vadd.f32 %v2174_v48, %v2167_v52 }
0x1940   : > { %v2165_v55 = vpop.permute.xlu1 %2164  ;;  %v2160_v56 = vpop.permute.xlu0 %2159 }
0x1941   : > { %2202 = vrot.lane.b32.xlu0 %v2192_v53, %s4015_s12  ;;  %2200 = vrot.lane.b32.xlu1 %v2191_v54, %s4015_s12  ;;  %v2169_v60 = vmul.f32 %v2160_v56, %v3830_v36  ;;  %v2170_v57 = vmul.f32 %v2165_v55, %v3832_v12 }
0x1944   : > { %v2189_v44 = vpop.permute.xlu1 %2188  ;;  %v2184_v0 = vpop.permute.xlu0 %2183 }
0x1945   : > { %v2193_v58 = vadd.f32 %v2184_v0, %v2169_v60  ;;  %2267 = vrot.lane.b32.xlu1 %v2191_v54, %s3206_s18  ;;  %v2194_v59 = vadd.f32 %v2189_v44, %v2170_v57 }
0x1947   : > { %2204 = vrot.lane.b32.xlu0 %v2193_v58, %s4015_s12 }
0x1948   : > { %v2223_v61 = vpop.permute.xlu1 %2222 }
0x1949   : > { %2206 = vrot.lane.b32.xlu1 %v2194_v59, %s4015_s12  ;;  %v2245_v3 = vpop.permute.xlu0 %2244 }
0x194a   : > { %v2259_v20 = vmul.f32 %v2245_v3, %v2191_v54 }
0x194b   : > { %2269 = vrot.lane.b32.xlu0 %v2192_v53, %s3206_s18 }
0x194d   : > { %2273 = vrot.lane.b32.xlu1 %v2194_v59, %s3206_s18  ;;  %v2249_v62 = vpop.permute.xlu1 %2248  ;;  %v2253_v5 = vpop.permute.xlu0 %2252 }
0x194e   : > { %v2260_v27 = vmul.f32 %v2249_v62, %v2192_v53  ;;  %v2261_v40 = vmul.f32 %v2253_v5, %v2193_v58 }
0x194f   : > { %2271 = vrot.lane.b32.xlu0 %v2193_v58, %s3206_s18 }
0x1952   : > { %v2228_v63 = vpop.permute.xlu1 %2227  ;;  %v2288_v8 = vpop.permute.xlu0 %2287 }
0x1956   : > { %v2292_v11 = vpop.permute.xlu0 %2291 }
0x1957   : > { %v2284_v4 = vpop.permute.xlu1 %2283 }
0x195b   : > { %v2218_v36 = vpop.permute.xlu0 %2217 }
0x195c   : > { %v2233_v7 = vpop.permute.xlu1 %2232 }
0x1961   : > { %v2257_v10 = vpop.permute.xlu1 %2256 }
0x1962   : > { %v2262_v35 = vmul.f32 %v2257_v10, %v2194_v59 }
0x1966   : > { %v2296_v33 = vpop.permute.xlu1 %2295 }
0x19b3   : > { %v2201_v12 = vpop.permute.xlu1 %2200  ;;  %v2203_v14 = vpop.permute.xlu0 %2202 }
0x19b4   : > { %v2211_v13 = vsel %vm2208_vm0, %v2201_v12, 0.0  ;;  %v2212_v17 = vsel %vm2208_vm0, %v2203_v14, 0.0 }
0x19b5   : > { %v2235_v16 = vmul.f32 %v2218_v36, %v2211_v13  ;;  %v2236_v22 = vmul.f32 %v2223_v61, %v2212_v17  ;;  %v2719_v17 = vld [vmem:[%s4007_s6 + $0x60] sm:$0xff] }
0x19b7   : > { %v2268_v15 = vpop.permute.xlu1 %2267  ;;  %v2263_v24 = vadd.f32 %v2259_v20, %v2235_v16  ;;  %v2264_v37 = vadd.f32 %v2260_v27, %v2236_v22 }
0x19b8   : > { %v2278_v18 = vsel %vm2275_vm7, %v2268_v15, 0.0 }
0x19b9   : > { %v2205_v19 = vpop.permute.xlu0 %2204  ;;  %v2298_v21 = vmul.f32 %v2284_v4, %v2278_v18  ;;  %v2720_v18 = vld [vmem:[%s4007_s6 + $0x68] sm:$0xff] }
0x19ba   : > { %v2213_v23 = vsel %vm2208_vm0, %v2205_v19, 0.0 }
0x19bb   : > { %v2207_v25 = vpop.permute.xlu1 %2206  ;;  %v2302_v30 = vadd.f32 %v2298_v21, %v2263_v24  ;;  %v2237_v31 = vmul.f32 %v2228_v63, %v2213_v23 }
0x19bc   : > { %v2214_v26 = vsel %vm2208_vm0, %v2207_v25, 0.0 }
0x19bd   : > { %v2238_v28 = vmul.f32 %v2233_v7, %v2214_v26  ;;  %v2270_v29 = vpop.permute.xlu0 %2269  ;;  %v2312_v46 = vmul.f32 %v2311_v38, %v2302_v30  ;;  %v2265_v47 = vadd.f32 %v2261_v40, %v2237_v31  ;;  %vm2307_vm9 = vcmp.ge.f32.partialorder %v2302_v30, 0.0  ;;  %v2721_v40 = vld [vmem:[%s4007_s6 + $0x70] sm:$0xff] }
0x19be   : > { %v2279_v32 = vsel %vm2275_vm7, %v2270_v29, 0.0  ;;  %v2716_v29 = vld [vmem:[%s4006_s5 + $0x68] sm:$0xff] }
0x19bf   : > { %v2299_v39 = vmul.f32 %v2288_v8, %v2279_v32  ;;  %v2274_v2 = vpop.permute.xlu1 %2273  ;;  %v2266_v43 = vadd.f32 %v2262_v35, %v2238_v28  ;;  %v2316_v54 = vsel %vm2307_vm9, %v2302_v30, %v2312_v46  ;;  %v2715_v28 = vld [vmem:[%s4006_s5 + $0x60] sm:$0xff]  ;;  %v2717_v35 = vld [vmem:[%s4006_s5 + $0x70] sm:$0xff] }
0x19c0   : > { %v2281_v42 = vsel %vm2275_vm7, %v2274_v2, 0.0 }
0x19c1   : > { %v2303_v6 = vadd.f32 %v2299_v39, %v2264_v37  ;;  %v2301_v9 = vmul.f32 %v2296_v33, %v2281_v42  ;;  %v2272_v45 = vpop.permute.xlu0 %2271  ;;  %v2722_v37 = vld [vmem:[%s4007_s6 + $0x78] sm:$0xff]  ;;  %v2723_v42 = vld [vmem:[%s4008_s7 + $0x30] sm:$0xff] }
0x19c2   : > { %v2280_v48 = vsel %vm2275_vm7, %v2272_v45, 0.0  ;;  %v2718_v39 = vld [vmem:[%s4006_s5 + $0x78] sm:$0xff]  ;;  %2863 = vmatprep.mubr.msk.f32.mxu1 %vm831_vm11, %v2723_v42 }
0x19c3   : > { %vm2308_vm8 = vcmp.ge.f32.partialorder %v2303_v6, 0.0  ;;  %v2313_v49 = vmul.f32 %v2311_v38, %v2303_v6  ;;  %v2305_v50 = vadd.f32 %v2301_v9, %v2266_v43  ;;  %v2300_v51 = vmul.f32 %v2292_v11, %v2280_v48 }
0x19c5   : > { %v2317_v52 = vsel %vm2308_vm8, %v2303_v6, %v2313_v49  ;;  %v2304_v53 = vadd.f32 %v2300_v51, %v2265_v47  ;;  %v2315_v55 = vmul.f32 %v2311_v38, %v2305_v50  ;;  %vm2310_vm12 = vcmp.ge.f32.partialorder %v2305_v50, 0.0 }
0x19c6   : > { %v2330_v60 = vadd.f32 %v2317_v52, %v2316_v54 }
0x19c7   : > { %vm2309_vm10 = vcmp.ge.f32.partialorder %v2304_v53, 0.0  ;;  %v2314_v56 = vmul.f32 %v2311_v38, %v2304_v53  ;;  %v2319_v57 = vsel %vm2310_vm12, %v2305_v50, %v2315_v55 }
0x19c9   : > { %v2318_v44 = vsel %vm2309_vm10, %v2304_v53, %v2314_v56 }
0x19ca   : > { %v2331_v0 = vadd.f32 %v2330_v60, %v2318_v44 }
0x19cc   : > { %v2332_v58 = vadd.f32 %v2331_v0, %v2319_v57 }
0x19ce   : > { %2333 = vadd.xlane.f32.xlu0 %v2332_v58 }
0x1a5b   : > { %v2334_v34 = vpop.xlane.xlu0 %2333 }
0x1a5c   : > { %v2335_v59 = vrot.slane %v2334_v34, 4 }
0x1a5e   : > { %v2336_v61 = vadd.f32 %v2335_v59, %v2334_v34 }
0x1a60   : > { %v2337_v62 = vrot.slane %v2336_v61, 2 }
0x1a62   : > { %v2338_v63 = vadd.f32 %v2337_v62, %v2336_v61 }
0x1a64   : > { %v2339_v3 = vrot.slane %v2338_v63, 1 }
0x1a66   : > { %v2340_v4 = vadd.f32 %v2339_v3, %v2338_v63 }
0x1a68   : > { %2956 = vpush %v2340_v4 }
0x1a99   : > { %s2957_s21 = spop %2956 }
0x1a9a   : > { %s2342_s26 = smul.f32 0.00024414063, %s2957_s21  ;;  %s2733_s21 = sshll.u32 %s3285_s17, 8 }
0x1a9c   : > { %v2343_v5 = vstv %s2342_s26 }
0x1a9d   : > { %v2344_v7 = vsub.f32 %v2316_v54, %v2343_v5  ;;  %v2345_v8 = vsub.f32 %v2317_v52, %v2343_v5  ;;  %v3911_v10 = vsub.f32 %v2318_v44, %v2343_v5  ;;  %v2347_v11 = vsub.f32 %v2319_v57, %v2343_v5  ;;  %v2724_v57 = vld [vmem:[%s4008_s7 + $0x38] sm:$0xff] }
0x1a9f   : > { %v2348_v33 = vmul.f32 %v2344_v7, %v2344_v7  ;;  %v2349_v36 = vmul.f32 %v2345_v8, %v2345_v8  ;;  %v2350_v12 = vmul.f32 %v3911_v10, %v3911_v10  ;;  %v2351_v14 = vmul.f32 %v2347_v11, %v2347_v11 }
0x1aa1   : > { %v2352_v13 = vadd.f32 %v2349_v36, %v2348_v33 }
0x1aa3   : > { %v2353_v15 = vadd.f32 %v2352_v13, %v2350_v12 }
0x1aa5   : > { %v2354_v16 = vadd.f32 %v2353_v15, %v2351_v14 }
0x1aa7   : > { %2355 = vadd.xlane.f32.xlu1 %v2354_v16 }
0x1ab8   : > { %2400 = vperm.xlu1 %3075, %v2719_v17  }
0x1abc   : > { %2405 = vperm.xlu1 %3075, %v2720_v18  }
0x1b34   : > { %v2356_v19 = vpop.xlane.xlu1 %2355 }
0x1b35   : > { %v2357_v20 = vrot.slane %v2356_v19, 4 }
0x1b37   : > { %v2358_v21 = vadd.f32 %v2357_v20, %v2356_v19 }
0x1b38   : > { %v2401_v43 = vpop.permute.xlu1 %2400 }
0x1b39   : > { %v2359_v22 = vrot.slane %v2358_v21, 2 }
0x1b3b   : > { %v2360_v23 = vadd.f32 %v2359_v22, %v2358_v21 }
0x1b3c   : > { %v2406_v6 = vpop.permute.xlu1 %2405 }
0x1b3d   : > { %v2361_v25 = vrot.slane %v2360_v23, 1 }
0x1b3f   : > { %v2362_v24 = vadd.f32 %v2361_v25, %v2360_v23 }
0x1b41   : > { %2958 = vpush %v2362_v24 }
0x1b72   : > { %s2959_s30 = spop %2958 }
0x1b73   : > { %s2364_s11 = smul.f32 0.00024414063, %s2959_s30  ;;  %s377_s30 = sand.u32 1, %s3184_s14  }
0x1b74   : > { %s3959_s25 = scalar_lea.sflag [#allocation3], %s377_s30 }
0x1b75   : > { %s2365_s18 = sadd.f32 1e-08, %s2364_s11  ;;  %s2616_s11 = sshll.u32 %s377_s30, 4 }
0x1b77   : > { %v2366_v26 = vstv %s2365_s18  ;;  %s379_s18 = scalar_lea.vmem [#allocation7], %s2616_s11  ;;  %s3126_s11 = sshll.u32 %s3207_s29, 4  ;;  %s3127_s11 = int_to_ptr.vmem [resolvable:$false] %s3126_s11 }
0x1b78   : > { %3090 = vrsqrt.f32 %v2366_v26  ;;  %s2524_s20 = sshll.u32 %s379_s18, 4  ;;  %s3128_s12 = scalar_lea.vmem %s3127_s11, 512  ;;  %s3951_s20 = int_to_ptr.vmem [resolvable:$true] %s2524_s20 }
0x1b79   : > { %s3122_s17 = scalar_lea.vmem %s3951_s20, 256  ;;  %p3129_p8 = scmp.lt.s32.totalorder %s3951_s20, %s3127_s11 }
0x1b7a   : > { %p3123_p10 = scmp.ne.s32.totalorder %s3951_s20, %s3122_s17  ;;  %p3130_p11 = scmp.lt.s32.totalorder %s3128_s12, %s3122_s17 }
0x1b7c   : > { %p3124_p0 = pnand %p3123_p10, %p4025_p12  ;;  %p3131_p13 = por %p3130_p11, %p3129_p8 }
0x1b7e   : > { %p3125_p7 = pneg %p3124_p0 }
0x1b80   : > { %p3132_p1 = pnand %p3131_p13, %p3125_p7 }
0x1b82   : > { %v3091_v27 = vpop.eup %3090 }
0x1b83   : > { %2960 = vpush %v3091_v27 }
0x1bb4   : > { %s2961_s28 = spop %2960 }
0x1bb5   : > { %v2369_v30 = vstv %s2961_s28  ;;  %s3957_s28 = scalar_lea.hbm %s4011_s10, %s2733_s21 }
0x1bb6   : > { %v2370_v31 = vmul.f32 %v2715_v28, %v2369_v30  ;;  %v2371_v32 = vmul.f32 %v2716_v29, %v2369_v30  ;;  %v2372_v38 = vmul.f32 %v2717_v35, %v2369_v30  ;;  %v2373_v2 = vmul.f32 %v2718_v39, %v2369_v30 }
0x1bb8   : > { %2381 = vperm.xlu1 %3075, %v2371_v32   ;;  %2376 = vperm.xlu0 %3073, %v2370_v31  }
0x1bbc   : > { %2386 = vperm.xlu1 %3075, %v2372_v38   ;;  %2415 = vperm.xlu0 %3073, %v2722_v37  }
0x1bc0   : > { %2391 = vperm.xlu1 %3075, %v2373_v2  }
0x1bc4   : > { %2410 = vperm.xlu1 %3075, %v2721_v40  }
0x1c37   : > { %v2377_v9 = vpop.permute.xlu0 %2376  ;;  %v2382_v45 = vpop.permute.xlu1 %2381 }
0x1c38   : > { %v2394_v46 = vmul.f32 %v2377_v9, %v2344_v7  ;;  %v2395_v47 = vmul.f32 %v2382_v45, %v2345_v8 }
0x1c3a   : > { %v2418_v48 = vadd.f32 %v2401_v43, %v2394_v46  ;;  %v2419_v49 = vadd.f32 %v2406_v6, %v2395_v47 }
0x1c3b   : > { %v2387_v50 = vpop.permute.xlu1 %2386  ;;  %v2416_v55 = vpop.permute.xlu0 %2415 }
0x1c3c   : > { %v2906_v51 = vpack.c.bf16 %v2419_v49, %v2418_v48  ;;  %v2396_v54 = vmul.f32 %v2387_v50, %v3911_v10 }
0x1c3e   : > { %2907 = vmatprep.subr.bf16.mxu1 %v2906_v51 }
0x1c3f   : > { %2909 = vmatpush3.bf16.msra.mxu1 %v2906_v51  ;;  %v2392_v52 = vpop.permute.xlu1 %2391 }
0x1c40   : > { %v2397_v53 = vmul.f32 %v2392_v52, %v2347_v11 }
0x1c42   : > { %v2421_v60 = vadd.f32 %v2416_v55, %v2397_v53 }
0x1c43   : > { %v2411_v56 = vpop.permute.xlu1 %2410 }
0x1c44   : > { %v2420_v44 = vadd.f32 %v2411_v56, %v2396_v54 }
0x1c46   : > { %v2910_v0 = vpack.c.bf16 %v2421_v60, %v2420_v44 }
0x1c48   : > { %2911 = vmatprep.subr.bf16.mxu1 %v2910_v0 }
0x1c49   : > { %2913 = vmatpush3.bf16.msra.mxu1 %v2910_v0 }
0x1c4c   : > { %2864 = vmatmul.mubr.msk.f32.vlgmr.msra.gmra.mrb[6].mxu1 %vm831_vm11, %v2724_v57 }
0x1d1f   : > { %v2865_v58 = vpop.f32.mrb[6].mxu1 }
0x1d20   : > { %v2507_v34 = vadd.f32 %v2865_v58, %v3804_v1  ;;  %v2497_v59 = vpop.f32.mrb[7].mxu1 }
0x1d21   : > { %v2506_v61 = vadd.f32 %v2497_v59, %v3807_v41 }
0x1d22   : > { %2509 = vst [vmem:[%s379_s18 + $0x8] sm:$0xff] %v2507_v34 }
0x1d23   : > { %2508 = vst [vmem:[%s379_s18] sm:$0xff] %v2506_v61 }
0x1d24   : > { %3135 = shalt.err (!%p3132_p1)
}
0x1d25   : > { %s3136_s30 = scalar_lea.hbm %s3957_s28, 256  ;;  %s3140_s26 = scalar_lea.hbm %s4011_s10, 512 }
0x1d26   : > { %p3137_p2 = scmp.ne.s32.totalorder %s3957_s28, %s3136_s30  ;;  %p3141_p9 = scmp.lt.u32.totalorder %s3957_s28, %s4011_s10 }
0x1d27   : > { %p3142_p5 = scmp.lt.u32.totalorder %s3140_s26, %s3136_s30  ;;  %p3144_p10 = scmp.lt.u32.totalorder %s3136_s30, %s3957_s28 }
0x1d28   : > { %p3138_p3 = pnand %p3137_p2, %p4025_p12 }
0x1d29   : > { %p3143_p6 = por %p3142_p5, %p3141_p9 }
0x1d2a   : > { %p3139_p4 = pneg %p3138_p3 }
0x1d2b   : > { %p3145_p0 = por %p3144_p10, %p3143_p6 }
0x1d2d   : > { %p3146_p7 = pnand %p3145_p0, %p3139_p4 }
0x1d2f   : > { %3149 = shalt.err (!%p3146_p7)
}
0x1d30   : > { %s3208_s12 = smov 128   ;;  %s4026_s17 = smov 8  }
0x1d31   : > { %2970 = dma.vmem_to_hbm [thread:$0]  (%p4025_p12), %s3951_s20, 256, %s3957_s28, %s3959_s25, %s3208_s12, %s3208_s12, %s4026_s17  }
0x1d32 PF: > { %p2987_p8 = scmp.ge.s32.totalorder %s3192_s16, 2  ;;  %s2539_s11 = sand.u32 1, %s3180_s13  }
0x1d33   : > { %p4027_p11 = scmp.ne.s32.totalorder %s4017_s24, 0  ;;  %s2540_s30 = scalar_lea.sflag [#allocation3], %s2539_s11 }
0x1d35   : > { %p2980_p13 = pnand %p2987_p8, %p4027_p11 }
0x1d37   : > { %3175 = dma.done.wait (!%p2980_p13), %s2540_s30, 256  }
0x1d38   : > { %3177 = vsyncadd (!%p2980_p13), %s2540_s30, 4294967040  ;;  %p22_p1 = scmp.ge.s32.totalorder %s3289_s19, 4   ;;  %s4028_s13 = smov %s3184_s14 }
0x1d39   : > { %s4029_s14 = smov %s3188_s15  ;;  %s4030_s15 = smov %s3300_s22 }
0x1d3a   : > { %s4031_s16 = smov %s3289_s19  ;;  %24 = sbr.rel (!%p22_p1) target bundleno = 5 (0x5), region = 125 }
0x1d41   :  { %2545 = vsyncpa [#allocation3], 1 }
0x1d42   :  { %2547 = vsyncpa [#allocation3 + $0x1], 1 }
0x1d43   :  { %2548 = vsyncpa [#allocation4], 1 }
0x1d44   :  { %2550 = vsyncpa [#allocation4 + $0x1], 1 }
0x1d45   :  { %2551 = vsyncpa [#allocation6], 1 }

</bundles_post_ra>
